<compile_context>
chip_gen: v5e
topology: v5e:2x2
jax: 0.10.0
libtpu: 0.0.40
codegen_flags: <defaults>
</compile_context>

<pallas_src>
import functools

import jax
import jax.numpy as jnp
from jax.experimental import pallas as pl
from jax.experimental.pallas import tpu as pltpu

BN_EPS = 1e-5
LANE = 128


def _round_up(n, m):
    return ((n + m - 1) // m) * m


# ----------------------------------- kernel -------------------------------------
def _cnn_lstm_kernel(xp_ref, m_ref, cbias_ref,
                     wih_ref, whh_ref, blstm_ref,
                     fc1w_ref, fc1b_ref, fc2w_ref, fc2b_ref,
                     out_ref, *, L, CP, HP):
    bt = xp_ref.shape[0]

    # ---- Conv1d(in=1,out=C,k=3,pad=1) + eval BN + ReLU as ONE banded matmul ----
    # xp row b = [0, x[b,0], ..., x[b,L-1], 0]; M[s, t*CP + c] = w[c,s-t]*bn_scale[c]
    # for s-t in {0,1,2}, else 0.  Result lanes are (t, c) with c minor, Cp=128.
    y = jnp.maximum(
        jnp.dot(xp_ref[...], m_ref[...], preferred_element_type=jnp.float32)
        + cbias_ref[...], 0.0)                                  # (bt, L*CP)

    wih = wih_ref[...]                                          # (CP, 4*HP)
    whh = whh_ref[...]                                          # (HP, 4*HP)
    blstm = blstm_ref[...]                                      # (1, 4*HP)

    # ---- LSTM input projections: lane-aligned slices, independent of h ---------
    gx = [jnp.dot(y[:, t * CP:(t + 1) * CP], wih,
                  preferred_element_type=jnp.float32) + blstm
          for t in range(L)]                                    # L x (bt, 4*HP)

    # ---- LSTM recurrence, gate blocks packed [i | f | o | g], each HP wide -----
    h = jnp.zeros((bt, HP), jnp.float32)
    c = jnp.zeros((bt, HP), jnp.float32)
    for t in range(L):                                          # fully unrolled
        g = gx[t] + jnp.dot(h, whh, preferred_element_type=jnp.float32)
        ifo = jax.nn.sigmoid(g[:, 0:3 * HP])                    # one EUP region
        gg = jnp.tanh(g[:, 3 * HP:4 * HP])
        c = ifo[:, HP:2 * HP] * c + ifo[:, 0:HP] * gg           # f*c + i*g
        h = ifo[:, 2 * HP:3 * HP] * jnp.tanh(c)                 # o*tanh(c)

    # ---- fc1 -> ReLU -> (dropout = identity in eval) -> fc2 (lane-dense out) ---
    z1 = jnp.maximum(
        jnp.dot(h, fc1w_ref[...], preferred_element_type=jnp.float32)
        + fc1b_ref[...], 0.0)
    # TODO(synk): nn.Dropout(0.3) is identity in eval/inference mode; no RNG applied.
    out_ref[...] = (jnp.dot(z1, fc2w_ref[...], preferred_element_type=jnp.float32)
                    + fc2b_ref[...])


# --------------------------- one-time parameter packing -------------------------
def prepare_params(params, *, seq_len):
    """Input-independent packing: BN fold, banded conv matrix, gate repack to
    [i,f,o,g], and zero-padding of every block to 128-lane boundaries."""
    C = params["conv_w"].shape[0]
    H = params["w_hh"].shape[1]
    F1 = params["fc1_w"].shape[0]
    NC = params["fc2_w"].shape[0]
    L = seq_len
    CP, HP, F1P, NCP = (_round_up(d, LANE) for d in (C, H, F1, NC))
    f32 = jnp.float32

    # Conv1d + eval-mode BN folded into one banded (L+2, L*CP) matrix + bias row.
    scale = params["bn_gamma"] / jnp.sqrt(params["bn_var"] + BN_EPS)        # (C,)
    shift = params["bn_beta"] - params["bn_mean"] * scale                   # (C,)
    wtap = (params["conv_w"][:, 0, :] * scale[:, None]).T                   # (3, C)
    m = jnp.zeros((L + 2, L * CP), f32)
    for t in range(L):
        m = m.at[t:t + 3, t * CP:t * CP + C].set(wtap)
    cb = jnp.zeros((CP,), f32).at[:C].set(params["conv_b"] * scale + shift)
    cbias = jnp.tile(cb, (L,)).reshape(1, L * CP)

    # LSTM: PyTorch packs gate rows as [i, f, g, o]; repack to [i, f, o, g] so one
    # sigmoid covers a contiguous 3*HP slice.  Pad each gate block to HP lanes and
    # the contraction rows to CP / HP (padded rows/cols are zero).
    perm = (0, 1, 3, 2)

    def pack_gate_mat(w, rows, rows_pad):
        out = jnp.zeros((rows_pad, 4 * HP), f32)
        for dst, src in enumerate(perm):
            out = out.at[:rows, dst * HP:dst * HP + H].set(
                w[src * H:(src + 1) * H, :].T)
        return out

    def pack_gate_vec(b):
        out = jnp.zeros((4 * HP,), f32)
        for dst, src in enumerate(perm):
            out = out.at[dst * HP:dst * HP + H].set(b[src * H:(src + 1) * H])
        return out.reshape(1, 4 * HP)

    wih = pack_gate_mat(params["w_ih"], C, CP)                  # (CP, 4*HP)
    whh = pack_gate_mat(params["w_hh"], H, HP)                  # (HP, 4*HP)
    blstm = pack_gate_vec(params["b_ih"] + params["b_hh"])      # (1, 4*HP)

    # FC head, zero-padded so dead h / z1 lanes contribute nothing.
    fc1w = jnp.zeros((HP, F1P), f32).at[:H, :F1].set(params["fc1_w"].T)
    fc1b = jnp.zeros((1, F1P), f32).at[0, :F1].set(params["fc1_b"])
    fc2w = jnp.zeros((F1P, NCP), f32).at[:F1, :NC].set(params["fc2_w"].T)
    fc2b = jnp.zeros((1, NCP), f32).at[0, :NC].set(params["fc2_b"])

    return dict(m=m, cbias=cbias, wih=wih, whh=whh, blstm=blstm,
                fc1w=fc1w, fc1b=fc1b, fc2w=fc2w, fc2b=fc2b)


# ----------------------------------- forward ------------------------------------
def cnn_lstm_forward(x_ncl, packed, *, num_classes):
    """x_ncl: (B, 1, L) float32, mirroring the PyTorch NCL conv input."""
    B, cin, L = x_ncl.shape
    assert cin == 1
    CP = packed["wih"].shape[0]
    HP = packed["whh"].shape[0]
    NCP = packed["fc2b"].shape[1]
    assert packed["m"].shape == (L + 2, L * CP)

    b_tile = min(128, ((B + 7) // 8) * 8)         # 8-sublane aligned batch tile
    n_tiles = pl.cdiv(B, b_tile)
    b_pad = n_tiles * b_tile

    # Per-call glue: squeeze channel, zero-pad batch rows + 1-sample conv halo.
    xp = jnp.pad(x_ncl[:, 0, :], ((0, b_pad - B), (1, 1)))       # (b_pad, L+2)

    weights = (packed["m"], packed["cbias"], packed["wih"], packed["whh"],
               packed["blstm"], packed["fc1w"], packed["fc1b"],
               packed["fc2w"], packed["fc2b"])

    kernel = functools.partial(_cnn_lstm_kernel, L=L, CP=CP, HP=HP)
    in_specs = [pl.BlockSpec((b_tile, L + 2), lambda i: (i, 0))]
    in_specs += [pl.BlockSpec(w.shape, lambda i: (0, 0)) for w in weights]

    out_pad = pl.pallas_call(
        kernel,
        out_shape=jax.ShapeDtypeStruct((b_pad, NCP), jnp.float32),
        grid=(n_tiles,),
        in_specs=in_specs,
        out_specs=pl.BlockSpec((b_tile, NCP), lambda i: (i, 0)),
        compiler_params=pltpu.CompilerParams(
            dimension_semantics=("parallel",)),       # shards across v7x TCs
    )(xp, *weights)

    return out_pad[:B, :num_classes]


# ---------------------------- pure-JAX reference --------------------------------
def reference_forward(x_ncl, p):
    B, _, L = x_ncl.shape
    x = x_ncl[:, 0, :]                                    # (B, L)
    xp = jnp.pad(x, ((0, 0), (1, 1)))                     # (B, L+2)
    w = p["conv_w"][:, 0, :]                              # (C, 3)
    y = (xp[:, None, 0:L] * w[None, :, 0:1]
         + xp[:, None, 1:L + 1] * w[None, :, 1:2]
         + xp[:, None, 2:L + 2] * w[None, :, 2:3])
    y = y + p["conv_b"][None, :, None]
    scale = p["bn_gamma"] / jnp.sqrt(p["bn_var"] + BN_EPS)
    shift = p["bn_beta"] - p["bn_mean"] * scale
    y = jnp.maximum(y * scale[None, :, None] + shift[None, :, None], 0.0)   # (B,C,L)
    seq = jnp.transpose(y, (2, 0, 1))                     # (L, B, C)

    H = p["w_hh"].shape[1]
    Wih, Whh = p["w_ih"], p["w_hh"]
    b_all = p["b_ih"] + p["b_hh"]

    def step(carry, xt):
        h, c = carry
        g = xt @ Wih.T + h @ Whh.T + b_all
        i = jax.nn.sigmoid(g[:, 0:H]); f = jax.nn.sigmoid(g[:, H:2 * H])
        gg = jnp.tanh(g[:, 2 * H:3 * H]); o = jax.nn.sigmoid(g[:, 3 * H:4 * H])
        c = f * c + i * gg
        h = o * jnp.tanh(c)
        return (h, c), None

    h0 = jnp.zeros((B, H), jnp.float32)
    (h, _), _ = jax.lax.scan(step, (h0, h0), seq)
    z = jnp.maximum(h @ p["fc1_w"].T + p["fc1_b"], 0.0)
    return z @ p["fc2_w"].T + p["fc2_b"]


if __name__ == "__main__":
    B, L = 2, 6                  # batch=2, sequence length=6 (matches input_size=6)
    C, H, FC1, NC = 32, 64, 128, 26

    key = jax.random.PRNGKey(0)
    ks = jax.random.split(key, 16)
    params = dict(
        conv_w=0.3 * jax.random.normal(ks[0], (C, 1, 3), jnp.float32),
        conv_b=0.1 * jax.random.normal(ks[1], (C,), jnp.float32),
        bn_gamma=1.0 + 0.1 * jax.random.normal(ks[2], (C,), jnp.float32),
        bn_beta=0.1 * jax.random.normal(ks[3], (C,), jnp.float32),
        bn_mean=0.1 * jax.random.normal(ks[4], (C,), jnp.float32),
        bn_var=1.0 + 0.1 * jnp.abs(jax.random.normal(ks[5], (C,), jnp.float32)),
        w_ih=0.2 * jax.random.normal(ks[6], (4 * H, C), jnp.float32),
        w_hh=0.2 * jax.random.normal(ks[7], (4 * H, H), jnp.float32),
        b_ih=0.1 * jax.random.normal(ks[8], (4 * H,), jnp.float32),
        b_hh=0.1 * jax.random.normal(ks[9], (4 * H,), jnp.float32),
        fc1_w=0.2 * jax.random.normal(ks[10], (FC1, H), jnp.float32),
        fc1_b=0.1 * jax.random.normal(ks[11], (FC1,), jnp.float32),
        fc2_w=0.2 * jax.random.normal(ks[12], (NC, FC1), jnp.float32),
        fc2_b=0.1 * jax.random.normal(ks[13], (NC,), jnp.float32),
    )
    x = jax.random.normal(ks[14], (B, 1, L), jnp.float32)   # PyTorch NCL input

    packed = jax.tree_util.tree_map(
        jax.block_until_ready, prepare_params(params, seq_len=L))  # one-time prep

    fwd = jax.jit(functools.partial(cnn_lstm_forward, num_classes=NC))
    out = jax.block_until_ready(fwd(x, packed))

    ref = jax.block_until_ready(reference_forward(x, params))
    assert out.shape == (B, NC)
    assert jnp.allclose(out, ref, rtol=1e-3, atol=1e-3), (out, ref)

    print("KERNEL_OK")
</pallas_src>

<mosaic_0001>
module attributes {stable_mosaic.version = 11 : i64} {
  func.func @_cnn_lstm_kernel(%arg0: i32, %arg1: memref<8x8xf32, #tpu.memory_space<vmem>>, %arg2: memref<8x768xf32, #tpu.memory_space<vmem>>, %arg3: memref<1x768xf32, #tpu.memory_space<vmem>>, %arg4: memref<128x512xf32, #tpu.memory_space<vmem>>, %arg5: memref<128x512xf32, #tpu.memory_space<vmem>>, %arg6: memref<1x512xf32, #tpu.memory_space<vmem>>, %arg7: memref<128x128xf32, #tpu.memory_space<vmem>>, %arg8: memref<1x128xf32, #tpu.memory_space<vmem>>, %arg9: memref<128x128xf32, #tpu.memory_space<vmem>>, %arg10: memref<1x128xf32, #tpu.memory_space<vmem>>, %arg11: memref<8x128xf32, #tpu.memory_space<vmem>>) attributes {dimension_semantics = [#tpu.dimension_semantics<parallel>], iteration_bounds = array<i64: 1>, scalar_prefetch = 0 : i64, scratch_operands = 0 : i64, tpu.core_type = #tpu.core_type<tc>, window_params = [{transform_indices = @transform_0, window_bounds = array<i64: 8, 8>}, {pipeline_mode = #tpu.pipeline_mode<synchronous>, transform_indices = @transform_1, window_bounds = array<i64: 8, 768>}, {pipeline_mode = #tpu.pipeline_mode<synchronous>, transform_indices = @transform_2, window_bounds = array<i64: 1, 768>}, {pipeline_mode = #tpu.pipeline_mode<synchronous>, transform_indices = @transform_3, window_bounds = array<i64: 128, 512>}, {pipeline_mode = #tpu.pipeline_mode<synchronous>, transform_indices = @transform_4, window_bounds = array<i64: 128, 512>}, {pipeline_mode = #tpu.pipeline_mode<synchronous>, transform_indices = @transform_5, window_bounds = array<i64: 1, 512>}, {pipeline_mode = #tpu.pipeline_mode<synchronous>, transform_indices = @transform_6, window_bounds = array<i64: 128, 128>}, {pipeline_mode = #tpu.pipeline_mode<synchronous>, transform_indices = @transform_7, window_bounds = array<i64: 1, 128>}, {pipeline_mode = #tpu.pipeline_mode<synchronous>, transform_indices = @transform_8, window_bounds = array<i64: 128, 128>}, {pipeline_mode = #tpu.pipeline_mode<synchronous>, transform_indices = @transform_9, window_bounds = array<i64: 1, 128>}, {transform_indices = @transform_10, window_bounds = array<i64: 8, 128>}]} {
    %c0 = arith.constant 0 : index
    %c0_0 = arith.constant 0 : index
    %0 = vector.load %arg1[%c0, %c0_0] : memref<8x8xf32, #tpu.memory_space<vmem>>, vector<8x8xf32>
    %c0_1 = arith.constant 0 : index
    %c0_2 = arith.constant 0 : index
    %1 = vector.load %arg2[%c0_1, %c0_2] : memref<8x768xf32, #tpu.memory_space<vmem>>, vector<8x768xf32>
    %cst = arith.constant dense<0.000000e+00> : vector<8x768xf32>
    %2 = tpu.matmul %0, %1, %cst {dimension_numbers = #tpu.dot_dimension_numbers<[1], [0], [0], [1], [0, 0, 1, 1], [], []>} : vector<8x8xf32>, vector<8x768xf32>, vector<8x768xf32> -> vector<8x768xf32>
    %c0_3 = arith.constant 0 : index
    %c0_4 = arith.constant 0 : index
    %3 = vector.load %arg3[%c0_3, %c0_4] : memref<1x768xf32, #tpu.memory_space<vmem>>, vector<1x768xf32>
    %4 = vector.broadcast %3 : vector<1x768xf32> to vector<8x768xf32>
    %5 = arith.addf %2, %4 : vector<8x768xf32>
    %cst_5 = arith.constant 0.000000e+00 : f32
    %6 = vector.broadcast %cst_5 : f32 to vector<8x768xf32>
    %7 = arith.maximumf %5, %6 : vector<8x768xf32>
    %c0_6 = arith.constant 0 : index
    %c0_7 = arith.constant 0 : index
    %8 = vector.load %arg4[%c0_6, %c0_7] : memref<128x512xf32, #tpu.memory_space<vmem>>, vector<128x512xf32>
    %c0_8 = arith.constant 0 : index
    %c0_9 = arith.constant 0 : index
    %9 = vector.load %arg5[%c0_8, %c0_9] : memref<128x512xf32, #tpu.memory_space<vmem>>, vector<128x512xf32>
    %c0_10 = arith.constant 0 : index
    %c0_11 = arith.constant 0 : index
    %10 = vector.load %arg6[%c0_10, %c0_11] : memref<1x512xf32, #tpu.memory_space<vmem>>, vector<1x512xf32>
    %11 = vector.extract_strided_slice %7 {offsets = [0, 0], sizes = [8, 128], strides = [1, 1]} : vector<8x768xf32> to vector<8x128xf32>
    %cst_12 = arith.constant dense<0.000000e+00> : vector<8x512xf32>
    %12 = tpu.matmul %11, %8, %cst_12 {dimension_numbers = #tpu.dot_dimension_numbers<[1], [0], [0], [1], [0, 0, 1, 1], [], []>} : vector<8x128xf32>, vector<128x512xf32>, vector<8x512xf32> -> vector<8x512xf32>
    %13 = vector.broadcast %10 : vector<1x512xf32> to vector<8x512xf32>
    %14 = arith.addf %12, %13 : vector<8x512xf32>
    %15 = vector.extract_strided_slice %7 {offsets = [0, 128], sizes = [8, 128], strides = [1, 1]} : vector<8x768xf32> to vector<8x128xf32>
    %cst_13 = arith.constant dense<0.000000e+00> : vector<8x512xf32>
    %16 = tpu.matmul %15, %8, %cst_13 {dimension_numbers = #tpu.dot_dimension_numbers<[1], [0], [0], [1], [0, 0, 1, 1], [], []>} : vector<8x128xf32>, vector<128x512xf32>, vector<8x512xf32> -> vector<8x512xf32>
    %17 = vector.broadcast %10 : vector<1x512xf32> to vector<8x512xf32>
    %18 = arith.addf %16, %17 : vector<8x512xf32>
    %19 = vector.extract_strided_slice %7 {offsets = [0, 256], sizes = [8, 128], strides = [1, 1]} : vector<8x768xf32> to vector<8x128xf32>
    %cst_14 = arith.constant dense<0.000000e+00> : vector<8x512xf32>
    %20 = tpu.matmul %19, %8, %cst_14 {dimension_numbers = #tpu.dot_dimension_numbers<[1], [0], [0], [1], [0, 0, 1, 1], [], []>} : vector<8x128xf32>, vector<128x512xf32>, vector<8x512xf32> -> vector<8x512xf32>
    %21 = vector.broadcast %10 : vector<1x512xf32> to vector<8x512xf32>
    %22 = arith.addf %20, %21 : vector<8x512xf32>
    %23 = vector.extract_strided_slice %7 {offsets = [0, 384], sizes = [8, 128], strides = [1, 1]} : vector<8x768xf32> to vector<8x128xf32>
    %cst_15 = arith.constant dense<0.000000e+00> : vector<8x512xf32>
    %24 = tpu.matmul %23, %8, %cst_15 {dimension_numbers = #tpu.dot_dimension_numbers<[1], [0], [0], [1], [0, 0, 1, 1], [], []>} : vector<8x128xf32>, vector<128x512xf32>, vector<8x512xf32> -> vector<8x512xf32>
    %25 = vector.broadcast %10 : vector<1x512xf32> to vector<8x512xf32>
    %26 = arith.addf %24, %25 : vector<8x512xf32>
    %27 = vector.extract_strided_slice %7 {offsets = [0, 512], sizes = [8, 128], strides = [1, 1]} : vector<8x768xf32> to vector<8x128xf32>
    %cst_16 = arith.constant dense<0.000000e+00> : vector<8x512xf32>
    %28 = tpu.matmul %27, %8, %cst_16 {dimension_numbers = #tpu.dot_dimension_numbers<[1], [0], [0], [1], [0, 0, 1, 1], [], []>} : vector<8x128xf32>, vector<128x512xf32>, vector<8x512xf32> -> vector<8x512xf32>
    %29 = vector.broadcast %10 : vector<1x512xf32> to vector<8x512xf32>
    %30 = arith.addf %28, %29 : vector<8x512xf32>
    %31 = vector.extract_strided_slice %7 {offsets = [0, 640], sizes = [8, 128], strides = [1, 1]} : vector<8x768xf32> to vector<8x128xf32>
    %cst_17 = arith.constant dense<0.000000e+00> : vector<8x512xf32>
    %32 = tpu.matmul %31, %8, %cst_17 {dimension_numbers = #tpu.dot_dimension_numbers<[1], [0], [0], [1], [0, 0, 1, 1], [], []>} : vector<8x128xf32>, vector<128x512xf32>, vector<8x512xf32> -> vector<8x512xf32>
    %33 = vector.broadcast %10 : vector<1x512xf32> to vector<8x512xf32>
    %34 = arith.addf %32, %33 : vector<8x512xf32>
    %cst_18 = arith.constant 0.000000e+00 : f32
    %35 = vector.broadcast %cst_18 : f32 to vector<8x128xf32>
    %cst_19 = arith.constant 0.000000e+00 : f32
    %36 = vector.broadcast %cst_19 : f32 to vector<8x128xf32>
    %cst_20 = arith.constant dense<0.000000e+00> : vector<8x512xf32>
    %37 = tpu.matmul %35, %9, %cst_20 {dimension_numbers = #tpu.dot_dimension_numbers<[1], [0], [0], [1], [0, 0, 1, 1], [], []>} : vector<8x128xf32>, vector<128x512xf32>, vector<8x512xf32> -> vector<8x512xf32>
    %38 = arith.addf %14, %37 : vector<8x512xf32>
    %39 = vector.extract_strided_slice %38 {offsets = [0, 0], sizes = [8, 384], strides = [1, 1]} : vector<8x512xf32> to vector<8x384xf32>
    %40 = arith.negf %39 : vector<8x384xf32>
    %41 = math.exp %40 : vector<8x384xf32>
    %cst_21 = arith.constant 1.000000e+00 : f32
    %42 = vector.broadcast %cst_21 : f32 to vector<8x384xf32>
    %43 = arith.addf %42, %41 : vector<8x384xf32>
    %44 = arith.divf %42, %43 : vector<8x384xf32>
    %45 = vector.extract_strided_slice %38 {offsets = [0, 384], sizes = [8, 128], strides = [1, 1]} : vector<8x512xf32> to vector<8x128xf32>
    %46 = math.tanh %45 : vector<8x128xf32>
    %47 = vector.extract_strided_slice %44 {offsets = [0, 128], sizes = [8, 128], strides = [1, 1]} : vector<8x384xf32> to vector<8x128xf32>
    %48 = arith.mulf %47, %36 : vector<8x128xf32>
    %49 = vector.extract_strided_slice %44 {offsets = [0, 0], sizes = [8, 128], strides = [1, 1]} : vector<8x384xf32> to vector<8x128xf32>
    %50 = arith.mulf %49, %46 : vector<8x128xf32>
    %51 = arith.addf %48, %50 : vector<8x128xf32>
    %52 = vector.extract_strided_slice %44 {offsets = [0, 256], sizes = [8, 128], strides = [1, 1]} : vector<8x384xf32> to vector<8x128xf32>
    %53 = math.tanh %51 : vector<8x128xf32>
    %54 = arith.mulf %52, %53 : vector<8x128xf32>
    %cst_22 = arith.constant dense<0.000000e+00> : vector<8x512xf32>
    %55 = tpu.matmul %54, %9, %cst_22 {dimension_numbers = #tpu.dot_dimension_numbers<[1], [0], [0], [1], [0, 0, 1, 1], [], []>} : vector<8x128xf32>, vector<128x512xf32>, vector<8x512xf32> -> vector<8x512xf32>
    %56 = arith.addf %18, %55 : vector<8x512xf32>
    %57 = vector.extract_strided_slice %56 {offsets = [0, 0], sizes = [8, 384], strides = [1, 1]} : vector<8x512xf32> to vector<8x384xf32>
    %58 = arith.negf %57 : vector<8x384xf32>
    %59 = math.exp %58 : vector<8x384xf32>
    %cst_23 = arith.constant 1.000000e+00 : f32
    %60 = vector.broadcast %cst_23 : f32 to vector<8x384xf32>
    %61 = arith.addf %60, %59 : vector<8x384xf32>
    %62 = arith.divf %60, %61 : vector<8x384xf32>
    %63 = vector.extract_strided_slice %56 {offsets = [0, 384], sizes = [8, 128], strides = [1, 1]} : vector<8x512xf32> to vector<8x128xf32>
    %64 = math.tanh %63 : vector<8x128xf32>
    %65 = vector.extract_strided_slice %62 {offsets = [0, 128], sizes = [8, 128], strides = [1, 1]} : vector<8x384xf32> to vector<8x128xf32>
    %66 = arith.mulf %65, %51 : vector<8x128xf32>
    %67 = vector.extract_strided_slice %62 {offsets = [0, 0], sizes = [8, 128], strides = [1, 1]} : vector<8x384xf32> to vector<8x128xf32>
    %68 = arith.mulf %67, %64 : vector<8x128xf32>
    %69 = arith.addf %66, %68 : vector<8x128xf32>
    %70 = vector.extract_strided_slice %62 {offsets = [0, 256], sizes = [8, 128], strides = [1, 1]} : vector<8x384xf32> to vector<8x128xf32>
    %71 = math.tanh %69 : vector<8x128xf32>
    %72 = arith.mulf %70, %71 : vector<8x128xf32>
    %cst_24 = arith.constant dense<0.000000e+00> : vector<8x512xf32>
    %73 = tpu.matmul %72, %9, %cst_24 {dimension_numbers = #tpu.dot_dimension_numbers<[1], [0], [0], [1], [0, 0, 1, 1], [], []>} : vector<8x128xf32>, vector<128x512xf32>, vector<8x512xf32> -> vector<8x512xf32>
    %74 = arith.addf %22, %73 : vector<8x512xf32>
    %75 = vector.extract_strided_slice %74 {offsets = [0, 0], sizes = [8, 384], strides = [1, 1]} : vector<8x512xf32> to vector<8x384xf32>
    %76 = arith.negf %75 : vector<8x384xf32>
    %77 = math.exp %76 : vector<8x384xf32>
    %cst_25 = arith.constant 1.000000e+00 : f32
    %78 = vector.broadcast %cst_25 : f32 to vector<8x384xf32>
    %79 = arith.addf %78, %77 : vector<8x384xf32>
    %80 = arith.divf %78, %79 : vector<8x384xf32>
    %81 = vector.extract_strided_slice %74 {offsets = [0, 384], sizes = [8, 128], strides = [1, 1]} : vector<8x512xf32> to vector<8x128xf32>
    %82 = math.tanh %81 : vector<8x128xf32>
    %83 = vector.extract_strided_slice %80 {offsets = [0, 128], sizes = [8, 128], strides = [1, 1]} : vector<8x384xf32> to vector<8x128xf32>
    %84 = arith.mulf %83, %69 : vector<8x128xf32>
    %85 = vector.extract_strided_slice %80 {offsets = [0, 0], sizes = [8, 128], strides = [1, 1]} : vector<8x384xf32> to vector<8x128xf32>
    %86 = arith.mulf %85, %82 : vector<8x128xf32>
    %87 = arith.addf %84, %86 : vector<8x128xf32>
    %88 = vector.extract_strided_slice %80 {offsets = [0, 256], sizes = [8, 128], strides = [1, 1]} : vector<8x384xf32> to vector<8x128xf32>
    %89 = math.tanh %87 : vector<8x128xf32>
    %90 = arith.mulf %88, %89 : vector<8x128xf32>
    %cst_26 = arith.constant dense<0.000000e+00> : vector<8x512xf32>
    %91 = tpu.matmul %90, %9, %cst_26 {dimension_numbers = #tpu.dot_dimension_numbers<[1], [0], [0], [1], [0, 0, 1, 1], [], []>} : vector<8x128xf32>, vector<128x512xf32>, vector<8x512xf32> -> vector<8x512xf32>
    %92 = arith.addf %26, %91 : vector<8x512xf32>
    %93 = vector.extract_strided_slice %92 {offsets = [0, 0], sizes = [8, 384], strides = [1, 1]} : vector<8x512xf32> to vector<8x384xf32>
    %94 = arith.negf %93 : vector<8x384xf32>
    %95 = math.exp %94 : vector<8x384xf32>
    %cst_27 = arith.constant 1.000000e+00 : f32
    %96 = vector.broadcast %cst_27 : f32 to vector<8x384xf32>
    %97 = arith.addf %96, %95 : vector<8x384xf32>
    %98 = arith.divf %96, %97 : vector<8x384xf32>
    %99 = vector.extract_strided_slice %92 {offsets = [0, 384], sizes = [8, 128], strides = [1, 1]} : vector<8x512xf32> to vector<8x128xf32>
    %100 = math.tanh %99 : vector<8x128xf32>
    %101 = vector.extract_strided_slice %98 {offsets = [0, 128], sizes = [8, 128], strides = [1, 1]} : vector<8x384xf32> to vector<8x128xf32>
    %102 = arith.mulf %101, %87 : vector<8x128xf32>
    %103 = vector.extract_strided_slice %98 {offsets = [0, 0], sizes = [8, 128], strides = [1, 1]} : vector<8x384xf32> to vector<8x128xf32>
    %104 = arith.mulf %103, %100 : vector<8x128xf32>
    %105 = arith.addf %102, %104 : vector<8x128xf32>
    %106 = vector.extract_strided_slice %98 {offsets = [0, 256], sizes = [8, 128], strides = [1, 1]} : vector<8x384xf32> to vector<8x128xf32>
    %107 = math.tanh %105 : vector<8x128xf32>
    %108 = arith.mulf %106, %107 : vector<8x128xf32>
    %cst_28 = arith.constant dense<0.000000e+00> : vector<8x512xf32>
    %109 = tpu.matmul %108, %9, %cst_28 {dimension_numbers = #tpu.dot_dimension_numbers<[1], [0], [0], [1], [0, 0, 1, 1], [], []>} : vector<8x128xf32>, vector<128x512xf32>, vector<8x512xf32> -> vector<8x512xf32>
    %110 = arith.addf %30, %109 : vector<8x512xf32>
    %111 = vector.extract_strided_slice %110 {offsets = [0, 0], sizes = [8, 384], strides = [1, 1]} : vector<8x512xf32> to vector<8x384xf32>
    %112 = arith.negf %111 : vector<8x384xf32>
    %113 = math.exp %112 : vector<8x384xf32>
    %cst_29 = arith.constant 1.000000e+00 : f32
    %114 = vector.broadcast %cst_29 : f32 to vector<8x384xf32>
    %115 = arith.addf %114, %113 : vector<8x384xf32>
    %116 = arith.divf %114, %115 : vector<8x384xf32>
    %117 = vector.extract_strided_slice %110 {offsets = [0, 384], sizes = [8, 128], strides = [1, 1]} : vector<8x512xf32> to vector<8x128xf32>
    %118 = math.tanh %117 : vector<8x128xf32>
    %119 = vector.extract_strided_slice %116 {offsets = [0, 128], sizes = [8, 128], strides = [1, 1]} : vector<8x384xf32> to vector<8x128xf32>
    %120 = arith.mulf %119, %105 : vector<8x128xf32>
    %121 = vector.extract_strided_slice %116 {offsets = [0, 0], sizes = [8, 128], strides = [1, 1]} : vector<8x384xf32> to vector<8x128xf32>
    %122 = arith.mulf %121, %118 : vector<8x128xf32>
    %123 = arith.addf %120, %122 : vector<8x128xf32>
    %124 = vector.extract_strided_slice %116 {offsets = [0, 256], sizes = [8, 128], strides = [1, 1]} : vector<8x384xf32> to vector<8x128xf32>
    %125 = math.tanh %123 : vector<8x128xf32>
    %126 = arith.mulf %124, %125 : vector<8x128xf32>
    %cst_30 = arith.constant dense<0.000000e+00> : vector<8x512xf32>
    %127 = tpu.matmul %126, %9, %cst_30 {dimension_numbers = #tpu.dot_dimension_numbers<[1], [0], [0], [1], [0, 0, 1, 1], [], []>} : vector<8x128xf32>, vector<128x512xf32>, vector<8x512xf32> -> vector<8x512xf32>
    %128 = arith.addf %34, %127 : vector<8x512xf32>
    %129 = vector.extract_strided_slice %128 {offsets = [0, 0], sizes = [8, 384], strides = [1, 1]} : vector<8x512xf32> to vector<8x384xf32>
    %130 = arith.negf %129 : vector<8x384xf32>
    %131 = math.exp %130 : vector<8x384xf32>
    %cst_31 = arith.constant 1.000000e+00 : f32
    %132 = vector.broadcast %cst_31 : f32 to vector<8x384xf32>
    %133 = arith.addf %132, %131 : vector<8x384xf32>
    %134 = arith.divf %132, %133 : vector<8x384xf32>
    %135 = vector.extract_strided_slice %128 {offsets = [0, 384], sizes = [8, 128], strides = [1, 1]} : vector<8x512xf32> to vector<8x128xf32>
    %136 = math.tanh %135 : vector<8x128xf32>
    %137 = vector.extract_strided_slice %134 {offsets = [0, 128], sizes = [8, 128], strides = [1, 1]} : vector<8x384xf32> to vector<8x128xf32>
    %138 = arith.mulf %137, %123 : vector<8x128xf32>
    %139 = vector.extract_strided_slice %134 {offsets = [0, 0], sizes = [8, 128], strides = [1, 1]} : vector<8x384xf32> to vector<8x128xf32>
    %140 = arith.mulf %139, %136 : vector<8x128xf32>
    %141 = arith.addf %138, %140 : vector<8x128xf32>
    %142 = vector.extract_strided_slice %134 {offsets = [0, 256], sizes = [8, 128], strides = [1, 1]} : vector<8x384xf32> to vector<8x128xf32>
    %143 = math.tanh %141 : vector<8x128xf32>
    %144 = arith.mulf %142, %143 : vector<8x128xf32>
    %c0_32 = arith.constant 0 : index
    %c0_33 = arith.constant 0 : index
    %145 = vector.load %arg7[%c0_32, %c0_33] : memref<128x128xf32, #tpu.memory_space<vmem>>, vector<128x128xf32>
    %cst_34 = arith.constant dense<0.000000e+00> : vector<8x128xf32>
    %146 = tpu.matmul %144, %145, %cst_34 {dimension_numbers = #tpu.dot_dimension_numbers<[1], [0], [0], [1], [0, 0, 1, 1], [], []>} : vector<8x128xf32>, vector<128x128xf32>, vector<8x128xf32> -> vector<8x128xf32>
    %c0_35 = arith.constant 0 : index
    %c0_36 = arith.constant 0 : index
    %147 = vector.load %arg8[%c0_35, %c0_36] : memref<1x128xf32, #tpu.memory_space<vmem>>, vector<1x128xf32>
    %148 = vector.broadcast %147 : vector<1x128xf32> to vector<8x128xf32>
    %149 = arith.addf %146, %148 : vector<8x128xf32>
    %cst_37 = arith.constant 0.000000e+00 : f32
    %150 = vector.broadcast %cst_37 : f32 to vector<8x128xf32>
    %151 = arith.maximumf %149, %150 : vector<8x128xf32>
    %c0_38 = arith.constant 0 : index
    %c0_39 = arith.constant 0 : index
    %152 = vector.load %arg9[%c0_38, %c0_39] : memref<128x128xf32, #tpu.memory_space<vmem>>, vector<128x128xf32>
    %cst_40 = arith.constant dense<0.000000e+00> : vector<8x128xf32>
    %153 = tpu.matmul %151, %152, %cst_40 {dimension_numbers = #tpu.dot_dimension_numbers<[1], [0], [0], [1], [0, 0, 1, 1], [], []>} : vector<8x128xf32>, vector<128x128xf32>, vector<8x128xf32> -> vector<8x128xf32>
    %c0_41 = arith.constant 0 : index
    %c0_42 = arith.constant 0 : index
    %154 = vector.load %arg10[%c0_41, %c0_42] : memref<1x128xf32, #tpu.memory_space<vmem>>, vector<1x128xf32>
    %155 = vector.broadcast %154 : vector<1x128xf32> to vector<8x128xf32>
    %156 = arith.addf %153, %155 : vector<8x128xf32>
    %c0_43 = arith.constant 0 : index
    %c0_44 = arith.constant 0 : index
    %157 = vector.load %arg11[%c0_43, %c0_44] : memref<8x128xf32, #tpu.memory_space<vmem>>, vector<8x128xf32>
    tpu.vector_store %arg11[%c0_43, %c0_44], %156 {strides = array<i32>} : memref<8x128xf32, #tpu.memory_space<vmem>>, vector<8x128xf32>,
    return
  }
  func.func @transform_0(%arg0: i32) -> (i32, i32) {
    %c0_i32 = arith.constant 0 : i32
    %c0_i32_0 = arith.constant 0 : i32
    return %arg0, %c0_i32 : i32, i32
  }
  func.func @transform_1(%arg0: i32) -> (i32, i32) {
    %c0_i32 = arith.constant 0 : i32
    %c0_i32_0 = arith.constant 0 : i32
    %c0_i32_1 = arith.constant 0 : i32
    return %c0_i32, %c0_i32_0 : i32, i32
  }
  func.func @transform_2(%arg0: i32) -> (i32, i32) {
    %c0_i32 = arith.constant 0 : i32
    %c0_i32_0 = arith.constant 0 : i32
    %c0_i32_1 = arith.constant 0 : i32
    return %c0_i32, %c0_i32_0 : i32, i32
  }
  func.func @transform_3(%arg0: i32) -> (i32, i32) {
    %c0_i32 = arith.constant 0 : i32
    %c0_i32_0 = arith.constant 0 : i32
    %c0_i32_1 = arith.constant 0 : i32
    return %c0_i32, %c0_i32_0 : i32, i32
  }
  func.func @transform_4(%arg0: i32) -> (i32, i32) {
    %c0_i32 = arith.constant 0 : i32
    %c0_i32_0 = arith.constant 0 : i32
    %c0_i32_1 = arith.constant 0 : i32
    return %c0_i32, %c0_i32_0 : i32, i32
  }
  func.func @transform_5(%arg0: i32) -> (i32, i32) {
    %c0_i32 = arith.constant 0 : i32
    %c0_i32_0 = arith.constant 0 : i32
    %c0_i32_1 = arith.constant 0 : i32
    return %c0_i32, %c0_i32_0 : i32, i32
  }
  func.func @transform_6(%arg0: i32) -> (i32, i32) {
    %c0_i32 = arith.constant 0 : i32
    %c0_i32_0 = arith.constant 0 : i32
    %c0_i32_1 = arith.constant 0 : i32
    return %c0_i32, %c0_i32_0 : i32, i32
  }
  func.func @transform_7(%arg0: i32) -> (i32, i32) {
    %c0_i32 = arith.constant 0 : i32
    %c0_i32_0 = arith.constant 0 : i32
    %c0_i32_1 = arith.constant 0 : i32
    return %c0_i32, %c0_i32_0 : i32, i32
  }
  func.func @transform_8(%arg0: i32) -> (i32, i32) {
    %c0_i32 = arith.constant 0 : i32
    %c0_i32_0 = arith.constant 0 : i32
    %c0_i32_1 = arith.constant 0 : i32
    return %c0_i32, %c0_i32_0 : i32, i32
  }
  func.func @transform_9(%arg0: i32) -> (i32, i32) {
    %c0_i32 = arith.constant 0 : i32
    %c0_i32_0 = arith.constant 0 : i32
    %c0_i32_1 = arith.constant 0 : i32
    return %c0_i32, %c0_i32_0 : i32, i32
  }
  func.func @transform_10(%arg0: i32) -> (i32, i32) {
    %c0_i32 = arith.constant 0 : i32
    %c0_i32_0 = arith.constant 0 : i32
    return %arg0, %c0_i32 : i32, i32
  }
}

</mosaic_0001>

<bundles_post_ra>
// kernel: cnn_lstm_forward.1
= control target key start
LH: loop header
LB: loop body
LE: loop exit
PB: predicated region body
PF: predicated region fallthrough
CT: control target
= control target key end

     0   :  { %15 = vsyncpa [#allocation3], 0  ;;  %s3409_s0 = inlined_call_operand.vmem [shape: f32[8,8], index: 0, kind: input, shape index: {}]   ;;  %s3410_s1 = inlined_call_operand.hbm [shape: f32[8,768], index: 1, kind: input, shape index: {}]   ;;  %s3411_s2 = inlined_call_operand.vmem [shape: f32[1,768], index: 2, kind: input, shape index: {}]   ;;  %s3412_s3 = inlined_call_operand.hbm [shape: f32[128,512], index: 3, kind: input, shape index: {}]   ;;  %s3413_s4 = inlined_call_operand.hbm [shape: f32[128,512], index: 4, kind: input, shape index: {}]   ;;  %s3414_s5 = inlined_call_operand.vmem [shape: f32[1,512], index: 5, kind: input, shape index: {}]   ;;  %s3415_s6 = inlined_call_operand.hbm [shape: f32[128,128], index: 6, kind: input, shape index: {}]   ;;  %s3416_s7 = inlined_call_operand.vmem [shape: f32[1,128], index: 7, kind: input, shape index: {}]   ;;  %s3417_s8 = inlined_call_operand.hbm [shape: f32[128,128], index: 8, kind: input, shape index: {}]   ;;  %s3418_s9 = inlined_call_operand.vmem [shape: f32[1,128], index: 9, kind: input, shape index: {}]   ;;  %s3419_s10 = inlined_call_operand.vmem [shape: f32[8,128], index: 10, kind: output, shape index: {}]  }
   0x1   :  { %16 = vsyncpa [#allocation5], 0  ;;  %s37_s15 = sshll.u32 %s3412_s3, 4  ;;  %s38_s15 = int_to_ptr.hbm [resolvable:$true] %s37_s15 }
   0x2   :  { %17 = vsyncpa [#allocation8], 0  ;;  %s2173_s16 = smov [#allocation4]   ;;  %s65_s20 = sshll.u32 %s3415_s6, 4  ;;  %s66_s20 = int_to_ptr.hbm [resolvable:$true] %s65_s20 }
   0x3   :  { %s39_s17 = sshll.u32 %s2173_s16, 4  ;;  %s2174_s21 = smov 512   ;;  %s40_s17 = int_to_ptr.vmem [resolvable:$true] %s39_s17 }
   0x4   :  { %s2175_s22 = smov 32   ;;  %s2176_s23 = smov [#allocation7]  }
   0x5   :  { %45 = dma.hbm_to_vmem [thread:$0]  %s38_s15, 8192, %s40_s17, [#allocation5], %s2174_s21, %s2174_s21, %s2175_s22  }
   0x6   :  { %s67_s24 = sshll.u32 %s2176_s23, 4  ;;  %s2177_s25 = smov 128   ;;  %s68_s24 = int_to_ptr.vmem [resolvable:$true] %s67_s24 }
   0x7   :  { %s2178_s26 = smov 8   ;;  %s25_s28 = sshll.u32 %s3410_s1, 4  ;;  %s26_s28 = int_to_ptr.hbm [resolvable:$true] %s25_s28 }
   0x8   :  { %73 = dma.hbm_to_vmem [thread:$0]  %s66_s20, 2048, %s68_s24, [#allocation8], %s2177_s25, %s2177_s25, %s2178_s26  }
   0x9   :  { %s2179_s29 = smov [#allocation2]   ;;  %s50_s12 = sshll.u32 %s3413_s4, 4  ;;  %s51_s12 = int_to_ptr.hbm [resolvable:$true] %s50_s12 }
   0xa   :  { %s27_s30 = sshll.u32 %s2179_s29, 4  ;;  %s2180_s13 = smov [#allocation6]   ;;  %s28_s30 = int_to_ptr.vmem [resolvable:$true] %s27_s30 }
   0xb   :  { %30 = dma.hbm_to_vmem [thread:$0]  %s26_s28, 768, %s28_s30, [#allocation3]  }
   0xc   :  { %s52_s14 = sshll.u32 %s2180_s13, 4  ;;  %s80_s17 = sshll.u32 %s3417_s8, 4  ;;  %s53_s14 = int_to_ptr.vmem [resolvable:$true] %s52_s14  ;;  %s81_s17 = int_to_ptr.hbm [resolvable:$true] %s80_s17 }
   0xd   :  { %58 = dma.hbm_to_vmem [thread:$0]  %s51_s12, 8192, %s53_s14, [#allocation5], %s2174_s21, %s2174_s21, %s2175_s22  }
   0xe   :  { %s2181_s1 = smov [#allocation9]  }
   0xf   :  { %s82_s18 = sshll.u32 %s2181_s1, 4  ;;  %s83_s18 = int_to_ptr.vmem [resolvable:$true] %s82_s18 }
  0x10   :  { %88 = dma.hbm_to_vmem [thread:$0]  %s81_s17, 2048, %s83_s18, [#allocation8], %s2177_s25, %s2177_s25, %s2178_s26  }
  0x11   :  { %2167 = dma.done.wait [#allocation3], 768  }
  0x12   :  { %2168 = vsyncadd [#allocation3], 4294966528 }
  0x13   :  { %2169 = dma.done.wait [#allocation5], 16384  }
  0x14   :  { %2170 = vsyncadd [#allocation5], 4294950912 }
  0x15   :  { %2171 = dma.done.wait [#allocation8], 4096  }
  0x16   :  { %2172 = vsyncadd [#allocation8], 4294963200  ;;  %vm132_vm0 = vcmask 64512   ;;  %v112_v0 = vld [vmem:[#allocation2] sm:$0xff]  ;;  %v113_v2 = vld [vmem:[#allocation2 + $0x8] sm:$0xff] }
  0x17   :  { %v2256_v1 = vld [vmem:[%s3409_s0] sm:$0xff]  ;;  %151 = vmatpush.msra.mxu0 %v112_v0  ;;  %171 = vmatpush.msra.mxu1 %v113_v2  ;;  %v114_v3 = vld [vmem:[#allocation2 + $0x10] sm:$0xff]  ;;  %v115_v4 = vld [vmem:[#allocation2 + $0x18] sm:$0xff] }
  0x18   :  { %v116_v5 = vld [vmem:[#allocation2 + $0x20] sm:$0xff]  ;;  %1851 = vmatmul.msk.f32.vlgmr.msra.gmra.mxu0 %vm132_vm0, %v2256_v1  ;;  %1852 = vmatmul.msk.f32.vlgmr.msra.gmra.mxu1 %vm132_vm0, %v2256_v1  ;;  %v117_v6 = vld [vmem:[#allocation2 + $0x28] sm:$0xff]  ;;  %v2262_v7 = vld [vmem:[#allocation4 + $0x1e0] sm:$0xff] }
  0x19   :  { %v2264_v8 = vld [vmem:[#allocation4 + $0x1e8] sm:$0xff]  ;;  %191 = vmatpush.msrb.mxu0 %v114_v3  ;;  %211 = vmatpush.msrb.mxu1 %v115_v4  ;;  %v2266_v9 = vld [vmem:[#allocation4 + $0x1c0] sm:$0xff]  ;;  %v2278_v13 = vld [vmem:[#allocation4 + $0x1f0] sm:$0xff] }
  0x1a   :  { %v2268_v10 = vld [vmem:[#allocation4 + $0x1c8] sm:$0xff]  ;;  %400 = vmatpush.msra.mxu2 %v2262_v7  ;;  %420 = vmatpush.msra.mxu3 %v2264_v8  ;;  %v2272_v11 = vld [vmem:[#allocation4 + $0x1a0] sm:$0xff]  ;;  %v2280_v14 = vld [vmem:[#allocation4 + $0x1f8] sm:$0xff] }
  0x1b   :  { %231 = vmatpush.msra.mxu0 %v116_v5  ;;  %251 = vmatpush.msra.mxu1 %v117_v6  ;;  %v2274_v12 = vld [vmem:[#allocation4 + $0x1a8] sm:$0xff]  ;;  %v2284_v15 = vld [vmem:[#allocation4 + $0x180] sm:$0xff]  ;;  %v2292_v17 = vld [vmem:[#allocation4 + $0x1d0] sm:$0xff] }
  0x1c   :  { %401 = vmatpush.msra.mxu2 %v2266_v9  ;;  %421 = vmatpush.msra.mxu3 %v2268_v10  ;;  %v2286_v16 = vld [vmem:[#allocation4 + $0x188] sm:$0xff]  ;;  %v2294_v18 = vld [vmem:[#allocation4 + $0x1d8] sm:$0xff]  ;;  %v2298_v19 = vld [vmem:[#allocation4 + $0x160] sm:$0xff] }
  0x1d   :  { %v2300_v20 = vld [vmem:[#allocation4 + $0x168] sm:$0xff]  ;;  %v2302_v21 = vld [vmem:[#allocation4 + $0x1b0] sm:$0xff]  ;;  %v2304_v22 = vld [vmem:[#allocation4 + $0x1b8] sm:$0xff] }
  0x1e   :  { %402 = vmatpush.msra.mxu2 %v2272_v11  ;;  %422 = vmatpush.msra.mxu3 %v2274_v12  ;;  %v2310_v23 = vld [vmem:[#allocation4 + $0x140] sm:$0xff]  ;;  %v2312_v24 = vld [vmem:[#allocation4 + $0x148] sm:$0xff]  ;;  %v2314_v25 = vld [vmem:[#allocation4 + $0x190] sm:$0xff] }
  0x1f   :  { %v2316_v26 = vld [vmem:[#allocation4 + $0x198] sm:$0xff]  ;;  %v2322_v27 = vld [vmem:[#allocation4 + $0x120] sm:$0xff]  ;;  %v2324_v28 = vld [vmem:[#allocation4 + $0x128] sm:$0xff] }
  0x20   :  { %1853 = vmatmul.msk.f32.vlgmr.msrb.gmra.mxu0 %vm132_vm0, %v2256_v1  ;;  %1854 = vmatmul.msk.f32.vlgmr.msrb.gmra.mxu1 %vm132_vm0, %v2256_v1  ;;  %v2326_v29 = vld [vmem:[#allocation4 + $0x170] sm:$0xff]  ;;  %v2328_v30 = vld [vmem:[#allocation4 + $0x178] sm:$0xff]  ;;  %v2334_v31 = vld [vmem:[#allocation4 + $0x100] sm:$0xff] }
  0x21   :  { %440 = vmatpush.msrb.mxu0 %v2278_v13  ;;  %460 = vmatpush.msrb.mxu1 %v2280_v14  ;;  %v2336_v32 = vld [vmem:[#allocation4 + $0x108] sm:$0xff]  ;;  %v2338_v33 = vld [vmem:[#allocation4 + $0x150] sm:$0xff]  ;;  %v2340_v34 = vld [vmem:[#allocation4 + $0x158] sm:$0xff] }
  0x22   :  { %403 = vmatpush.msra.mxu2 %v2284_v15  ;;  %423 = vmatpush.msra.mxu3 %v2286_v16  ;;  %v2346_v35 = vld [vmem:[#allocation4 + $0xe0] sm:$0xff]  ;;  %v2348_v36 = vld [vmem:[#allocation4 + $0xe8] sm:$0xff]  ;;  %v2350_v37 = vld [vmem:[#allocation4 + $0x130] sm:$0xff] }
  0x23   :  { %441 = vmatpush.msrb.mxu0 %v2292_v17  ;;  %461 = vmatpush.msrb.mxu1 %v2294_v18  ;;  %3513 = vst [vmem:[#allocation13_spill] sm:$0xff] %v2346_v35  ;;  %v2352_v38 = vld [vmem:[#allocation4 + $0x138] sm:$0xff]  ;;  %v2358_v39 = vld [vmem:[#allocation4 + $0xc0] sm:$0xff]  ;;  %v2360_v40 = vld [vmem:[#allocation4 + $0xc8] sm:$0xff] }
  0x24   :  { %404 = vmatpush.msra.mxu2 %v2298_v19  ;;  %424 = vmatpush.msra.mxu3 %v2300_v20  ;;  %3514 = vst [vmem:[#allocation14_spill] sm:$0xff] %v2360_v40  ;;  %v2362_v41 = vld [vmem:[#allocation4 + $0x110] sm:$0xff]  ;;  %v2364_v42 = vld [vmem:[#allocation4 + $0x118] sm:$0xff]  ;;  %v2370_v43 = vld [vmem:[#allocation4 + $0xa0] sm:$0xff] }
  0x25   :  { %442 = vmatpush.msrb.mxu0 %v2302_v21  ;;  %462 = vmatpush.msrb.mxu1 %v2304_v22  ;;  %v2372_v44 = vld [vmem:[#allocation4 + $0xa8] sm:$0xff]  ;;  %v2374_v45 = vld [vmem:[#allocation4 + $0xf0] sm:$0xff]  ;;  %v2376_v46 = vld [vmem:[#allocation4 + $0xf8] sm:$0xff] }
  0x26   :  { %405 = vmatpush.msra.mxu2 %v2310_v23  ;;  %425 = vmatpush.msra.mxu3 %v2312_v24  ;;  %3515 = vst [vmem:[#allocation15_spill] sm:$0xff] %v2372_v44  ;;  %v2382_v47 = vld [vmem:[#allocation4 + $0x80] sm:$0xff]  ;;  %v2384_v48 = vld [vmem:[#allocation4 + $0x88] sm:$0xff]  ;;  %v2386_v49 = vld [vmem:[#allocation4 + $0xd0] sm:$0xff] }
  0x27   :  { %443 = vmatpush.msrb.mxu0 %v2314_v25  ;;  %463 = vmatpush.msrb.mxu1 %v2316_v26  ;;  %3516 = vst [vmem:[#allocation16_spill] sm:$0xff] %v2374_v45  ;;  %v2388_v50 = vld [vmem:[#allocation4 + $0xd8] sm:$0xff]  ;;  %v2394_v51 = vld [vmem:[#allocation4 + $0x60] sm:$0xff]  ;;  %v2396_v52 = vld [vmem:[#allocation4 + $0x68] sm:$0xff] }
  0x28   :  { %406 = vmatpush.msra.mxu2 %v2322_v27  ;;  %426 = vmatpush.msra.mxu3 %v2324_v28  ;;  %3517 = vst [vmem:[#allocation17_spill] sm:$0xff] %v2382_v47  ;;  %v2398_v53 = vld [vmem:[#allocation4 + $0xb0] sm:$0xff]  ;;  %v2400_v54 = vld [vmem:[#allocation4 + $0xb8] sm:$0xff]  ;;  %v2406_v55 = vld [vmem:[#allocation4 + $0x40] sm:$0xff] }
  0x29   :  { %444 = vmatpush.msrb.mxu0 %v2326_v29  ;;  %464 = vmatpush.msrb.mxu1 %v2328_v30  ;;  %3518 = vst [vmem:[#allocation18_spill] sm:$0xff] %v2384_v48  ;;  %v2408_v56 = vld [vmem:[#allocation4 + $0x48] sm:$0xff]  ;;  %v2410_v57 = vld [vmem:[#allocation4 + $0x90] sm:$0xff]  ;;  %v2412_v58 = vld [vmem:[#allocation4 + $0x98] sm:$0xff] }
  0x2a   :  { %407 = vmatpush.msra.mxu2 %v2334_v31  ;;  %427 = vmatpush.msra.mxu3 %v2336_v32  ;;  %3519 = vst [vmem:[#allocation19_spill] sm:$0xff] %v2386_v49  ;;  %v2418_v59 = vld [vmem:[#allocation4 + $0x20] sm:$0xff]  ;;  %v2420_v60 = vld [vmem:[#allocation4 + $0x28] sm:$0xff]  ;;  %v2422_v61 = vld [vmem:[#allocation4 + $0x70] sm:$0xff] }
  0x2b   :  { %445 = vmatpush.msrb.mxu0 %v2338_v33  ;;  %465 = vmatpush.msrb.mxu1 %v2340_v34  ;;  %3520 = vst [vmem:[#allocation20_spill] sm:$0xff] %v2388_v50  ;;  %v2424_v62 = vld [vmem:[#allocation4 + $0x78] sm:$0xff]  ;;  %v2430_v63 = vld [vmem:[#allocation4] sm:$0xff]  ;;  %v2432_v0 = vld [vmem:[#allocation4 + $0x8] sm:$0xff] }
  0x2c   :  { %408 = vmatpush.msra.mxu2 %v2346_v35  ;;  %428 = vmatpush.msra.mxu3 %v2348_v36  ;;  %3521 = vst [vmem:[#allocation21_spill] sm:$0xff] %v2394_v51  ;;  %v2434_v2 = vld [vmem:[#allocation4 + $0x50] sm:$0xff]  ;;  %v2436_v3 = vld [vmem:[#allocation4 + $0x58] sm:$0xff] }
  0x2d   :  { %446 = vmatpush.msrb.mxu0 %v2350_v37  ;;  %466 = vmatpush.msrb.mxu1 %v2352_v38  ;;  %3522 = vst [vmem:[#allocation22_spill] sm:$0xff] %v2410_v57  ;;  %v2442_v4 = vld [vmem:[#allocation4 + $0x30] sm:$0xff]  ;;  %v2444_v5 = vld [vmem:[#allocation4 + $0x38] sm:$0xff] }
  0x2e   :  { %409 = vmatpush.msra.mxu2 %v2358_v39  ;;  %429 = vmatpush.msra.mxu3 %v2360_v40  ;;  %3523 = vst [vmem:[#allocation23_spill] sm:$0xff] %v2412_v58  ;;  %v2450_v6 = vld [vmem:[#allocation4 + $0x10] sm:$0xff] }
  0x2f   :  { %447 = vmatpush.msrb.mxu0 %v2362_v41  ;;  %467 = vmatpush.msrb.mxu1 %v2364_v42  ;;  %3524 = vst [vmem:[#allocation24_spill] sm:$0xff] %v2418_v59 }
  0x30   :  { %410 = vmatpush.msra.mxu2 %v2370_v43  ;;  %430 = vmatpush.msra.mxu3 %v2372_v44  ;;  %3525 = vst [vmem:[#allocation25_spill] sm:$0xff] %v2420_v60 }
  0x31   :  { %448 = vmatpush.msrb.mxu0 %v2374_v45  ;;  %468 = vmatpush.msrb.mxu1 %v2376_v46  ;;  %3526 = vst [vmem:[#allocation26_spill] sm:$0xff] %v2434_v2 }
  0x32   :  { %411 = vmatpush.msra.mxu2 %v2382_v47  ;;  %431 = vmatpush.msra.mxu3 %v2384_v48  ;;  %3527 = vst [vmem:[#allocation27_spill] sm:$0xff] %v2436_v3 }
  0x33   :  { %449 = vmatpush.msrb.mxu0 %v2386_v49  ;;  %469 = vmatpush.msrb.mxu1 %v2388_v50  ;;  %3528 = vst [vmem:[#allocation28_spill] sm:$0xff] %v2442_v4 }
  0x34   :  { %412 = vmatpush.msra.mxu2 %v2394_v51  ;;  %432 = vmatpush.msra.mxu3 %v2396_v52 }
  0x35   :  { %450 = vmatpush.msrb.mxu0 %v2398_v53  ;;  %470 = vmatpush.msrb.mxu1 %v2400_v54 }
  0x36   :  { %413 = vmatpush.msra.mxu2 %v2406_v55  ;;  %433 = vmatpush.msra.mxu3 %v2408_v56 }
  0x37   :  { %451 = vmatpush.msrb.mxu0 %v2410_v57  ;;  %471 = vmatpush.msrb.mxu1 %v2412_v58 }
  0x38   :  { %414 = vmatpush.msra.mxu2 %v2418_v59  ;;  %434 = vmatpush.msra.mxu3 %v2420_v60  ;;  %v2452_v59 = vld [vmem:[#allocation4 + $0x18] sm:$0xff] }
  0x39   :  { %452 = vmatpush.msrb.mxu0 %v2422_v61  ;;  %472 = vmatpush.msrb.mxu1 %v2424_v62 }
  0x3a   :  { %415 = vmatpush.msra.mxu2 %v2430_v63  ;;  %435 = vmatpush.msra.mxu3 %v2432_v0 }
  0x3b   :  { %453 = vmatpush.msrb.mxu0 %v2434_v2  ;;  %473 = vmatpush.msrb.mxu1 %v2436_v3 }
  0x3c   :  { %1855 = vmatmul.msk.f32.vlgmr.msra.gmra.mxu0 %vm132_vm0, %v2256_v1  ;;  %1856 = vmatmul.msk.f32.vlgmr.msra.gmra.mxu1 %vm132_vm0, %v2256_v1  ;;  %v3529_v1 = vld [vmem:[#allocation24_spill] sm:$0xff] }
  0x3d   :  { %454 = vmatpush.msrb.mxu0 %v2442_v4  ;;  %474 = vmatpush.msrb.mxu1 %v2444_v5 }
  0x3e   :  { %480 = vmatpush.msrb.mxu2 %v2262_v7  ;;  %500 = vmatpush.msrb.mxu3 %v2264_v8 }
  0x3f   :  { %455 = vmatpush.msrb.mxu0 %v2450_v6  ;;  %475 = vmatpush.msrb.mxu1 %v2452_v59 }
  0x40   :  { %481 = vmatpush.msrb.mxu2 %v2266_v9  ;;  %501 = vmatpush.msrb.mxu3 %v2268_v10 }
  0x41   :  { %520 = vmatpush.msra.mxu0 %v2278_v13  ;;  %540 = vmatpush.msra.mxu1 %v2280_v14 }
  0x42   :  { %482 = vmatpush.msrb.mxu2 %v2272_v11  ;;  %502 = vmatpush.msrb.mxu3 %v2274_v12 }
  0x43   :  { %521 = vmatpush.msra.mxu0 %v2292_v17  ;;  %541 = vmatpush.msra.mxu1 %v2294_v18 }
  0x44   :  { %483 = vmatpush.msrb.mxu2 %v2284_v15  ;;  %503 = vmatpush.msrb.mxu3 %v2286_v16 }
  0x45   :  { %522 = vmatpush.msra.mxu0 %v2302_v21  ;;  %542 = vmatpush.msra.mxu1 %v2304_v22 }
  0x46   :  { %484 = vmatpush.msrb.mxu2 %v2298_v19  ;;  %504 = vmatpush.msrb.mxu3 %v2300_v20 }
  0x47   :  { %523 = vmatpush.msra.mxu0 %v2314_v25  ;;  %543 = vmatpush.msra.mxu1 %v2316_v26 }
  0x48   :  { %485 = vmatpush.msrb.mxu2 %v2310_v23  ;;  %505 = vmatpush.msrb.mxu3 %v2312_v24 }
  0x49   :  { %524 = vmatpush.msra.mxu0 %v2326_v29  ;;  %544 = vmatpush.msra.mxu1 %v2328_v30 }
  0x4a   :  { %486 = vmatpush.msrb.mxu2 %v2322_v27  ;;  %506 = vmatpush.msrb.mxu3 %v2324_v28 }
  0x4b   :  { %525 = vmatpush.msra.mxu0 %v2338_v33  ;;  %545 = vmatpush.msra.mxu1 %v2340_v34 }
  0x4c   :  { %487 = vmatpush.msrb.mxu2 %v2334_v31  ;;  %507 = vmatpush.msrb.mxu3 %v2336_v32 }
  0x4d   :  { %526 = vmatpush.msra.mxu0 %v2350_v37  ;;  %546 = vmatpush.msra.mxu1 %v2352_v38 }
  0x4e   :  { %488 = vmatpush.msrb.mxu2 %v2346_v35  ;;  %508 = vmatpush.msrb.mxu3 %v2348_v36 }
  0x4f   :  { %527 = vmatpush.msra.mxu0 %v2362_v41  ;;  %547 = vmatpush.msra.mxu1 %v2364_v42 }
  0x50   :  { %489 = vmatpush.msrb.mxu2 %v2358_v39  ;;  %509 = vmatpush.msrb.mxu3 %v2360_v40 }
  0x51   :  { %528 = vmatpush.msra.mxu0 %v2374_v45  ;;  %548 = vmatpush.msra.mxu1 %v2376_v46 }
  0x52   :  { %490 = vmatpush.msrb.mxu2 %v2370_v43  ;;  %510 = vmatpush.msrb.mxu3 %v2372_v44 }
  0x53   :  { %529 = vmatpush.msra.mxu0 %v2386_v49  ;;  %549 = vmatpush.msra.mxu1 %v2388_v50 }
  0x54   :  { %491 = vmatpush.msrb.mxu2 %v2382_v47  ;;  %511 = vmatpush.msrb.mxu3 %v2384_v48 }
  0x55   :  { %530 = vmatpush.msra.mxu0 %v2398_v53  ;;  %550 = vmatpush.msra.mxu1 %v2400_v54 }
  0x56   :  { %492 = vmatpush.msrb.mxu2 %v2394_v51  ;;  %512 = vmatpush.msrb.mxu3 %v2396_v52 }
  0x57   :  { %531 = vmatpush.msra.mxu0 %v2410_v57  ;;  %551 = vmatpush.msra.mxu1 %v2412_v58 }
  0x58   :  { %493 = vmatpush.msrb.mxu2 %v2406_v55  ;;  %513 = vmatpush.msrb.mxu3 %v2408_v56 }
  0x59   :  { %532 = vmatpush.msra.mxu0 %v2422_v61  ;;  %552 = vmatpush.msra.mxu1 %v2424_v62 }
  0x5a   :  { %494 = vmatpush.msrb.mxu2 %v3529_v1  ;;  %514 = vmatpush.msrb.mxu3 %v2420_v60 }
  0x5b   :  { %533 = vmatpush.msra.mxu0 %v2434_v2  ;;  %553 = vmatpush.msra.mxu1 %v2436_v3  ;;  %v2529_v3 = vld [vmem:[%s3411_s2] sm:$0x3f] }
  0x5c   :  { %495 = vmatpush.msrb.mxu2 %v2430_v63  ;;  %515 = vmatpush.msrb.mxu3 %v2432_v0  ;;  %v120_v1 = vperm.slane %v2529_v3, 0 }
  0x5d   :  { %534 = vmatpush.msra.mxu0 %v2442_v4  ;;  %554 = vmatpush.msra.mxu1 %v2444_v5 }
  0x5f   :  { %535 = vmatpush.msra.mxu0 %v2450_v6  ;;  %555 = vmatpush.msra.mxu1 %v2452_v59 }
  0x95   :  { %v153_v60 = vpop.f32.mrf.mxu0 }
  0x96   :  { %v154_v2 = vadd.f32 %v153_v60, %v120_v1  ;;  %v121_v60 = vperm.slane %v2529_v3, 1  ;;  %v3530_v1 = vld [vmem:[#allocation26_spill] sm:$0xff] }
  0x98   :  { %v256_v4 = vmax.f32 %v154_v2, 0.0  ;;  %v173_v2 = vpop.f32.mrf.mxu1 }
  0x9a   :  { %416 = vmatmul.f32.vlgmr.msra.gmra.mxu2 %v256_v4  ;;  %436 = vmatmul.f32.vlgmr.msra.gmra.mxu3 %v256_v4 }
  0x9b   :  { %456 = vmatmul.f32.vlgmr.msrb.gmra.mxu0 %v256_v4  ;;  %476 = vmatmul.f32.vlgmr.msrb.gmra.mxu1 %v256_v4  ;;  %v174_v4 = vadd.f32 %v173_v2, %v121_v60  ;;  %v3535_v2 = vld [vmem:[#allocation17_spill] sm:$0xff] }
  0x9c   :  { %560 = vmatpush.msra.mxu2 %v2262_v7  ;;  %580 = vmatpush.msra.mxu3 %v2264_v8 }
  0x9d   :  { %600 = vmatpush.msrb.mxu0 %v2278_v13  ;;  %620 = vmatpush.msrb.mxu1 %v2280_v14  ;;  %v193_v60 = vpop.f32.mrf.mxu0 }
  0x9e   :  { %561 = vmatpush.msra.mxu2 %v2266_v9  ;;  %581 = vmatpush.msra.mxu3 %v2268_v10 }
  0x9f   :  { %601 = vmatpush.msrb.mxu0 %v2292_v17  ;;  %621 = vmatpush.msrb.mxu1 %v2294_v18 }
  0xa0   :  { %562 = vmatpush.msra.mxu2 %v2272_v11  ;;  %582 = vmatpush.msra.mxu3 %v2274_v12 }
  0xa1   :  { %602 = vmatpush.msrb.mxu0 %v2302_v21  ;;  %622 = vmatpush.msrb.mxu1 %v2304_v22 }
  0xa2   :  { %563 = vmatpush.msra.mxu2 %v2284_v15  ;;  %583 = vmatpush.msra.mxu3 %v2286_v16 }
  0xa3   :  { %603 = vmatpush.msrb.mxu0 %v2314_v25  ;;  %623 = vmatpush.msrb.mxu1 %v2316_v26 }
  0xa4   :  { %564 = vmatpush.msra.mxu2 %v2298_v19  ;;  %584 = vmatpush.msra.mxu3 %v2300_v20 }
  0xa5   :  { %604 = vmatpush.msrb.mxu0 %v2326_v29  ;;  %624 = vmatpush.msrb.mxu1 %v2328_v30 }
  0xa6   :  { %565 = vmatpush.msra.mxu2 %v2310_v23  ;;  %585 = vmatpush.msra.mxu3 %v2312_v24 }
  0xa7   :  { %605 = vmatpush.msrb.mxu0 %v2338_v33  ;;  %625 = vmatpush.msrb.mxu1 %v2340_v34 }
  0xa8   :  { %566 = vmatpush.msra.mxu2 %v2322_v27  ;;  %586 = vmatpush.msra.mxu3 %v2324_v28 }
  0xa9   :  { %606 = vmatpush.msrb.mxu0 %v2350_v37  ;;  %626 = vmatpush.msrb.mxu1 %v2352_v38 }
  0xaa   :  { %567 = vmatpush.msra.mxu2 %v2334_v31  ;;  %587 = vmatpush.msra.mxu3 %v2336_v32 }
  0xab   :  { %607 = vmatpush.msrb.mxu0 %v2362_v41  ;;  %627 = vmatpush.msrb.mxu1 %v2364_v42 }
  0xac   :  { %568 = vmatpush.msra.mxu2 %v2346_v35  ;;  %588 = vmatpush.msra.mxu3 %v2348_v36 }
  0xad   :  { %608 = vmatpush.msrb.mxu0 %v2374_v45  ;;  %628 = vmatpush.msrb.mxu1 %v2376_v46 }
  0xae   :  { %569 = vmatpush.msra.mxu2 %v2358_v39  ;;  %589 = vmatpush.msra.mxu3 %v2360_v40 }
  0xaf   :  { %609 = vmatpush.msrb.mxu0 %v2386_v49  ;;  %629 = vmatpush.msrb.mxu1 %v2388_v50 }
  0xb0   :  { %570 = vmatpush.msra.mxu2 %v2370_v43  ;;  %590 = vmatpush.msra.mxu3 %v2372_v44 }
  0xb1   :  { %610 = vmatpush.msrb.mxu0 %v2398_v53  ;;  %630 = vmatpush.msrb.mxu1 %v2400_v54 }
  0xb2   :  { %571 = vmatpush.msra.mxu2 %v2382_v47  ;;  %591 = vmatpush.msra.mxu3 %v2384_v48  ;;  %v3531_v48 = vld [vmem:[#allocation27_spill] sm:$0xff]  ;;  %v3532_v47 = vld [vmem:[#allocation24_spill] sm:$0xff] }
  0xb3   :  { %611 = vmatpush.msrb.mxu0 %v2410_v57  ;;  %631 = vmatpush.msrb.mxu1 %v2412_v58  ;;  %v257_v57 = vmax.f32 %v174_v4, 0.0  ;;  %v3533_v58 = vld [vmem:[#allocation25_spill] sm:$0xff]  ;;  %v3536_v4 = vld [vmem:[#allocation18_spill] sm:$0xff] }
  0xb4   :  { %572 = vmatpush.msra.mxu2 %v2394_v51  ;;  %592 = vmatpush.msra.mxu3 %v2396_v52  ;;  %v3534_v51 = vld [vmem:[#allocation28_spill] sm:$0xff] }
  0xb5   :  { %612 = vmatpush.msrb.mxu0 %v2422_v61  ;;  %632 = vmatpush.msrb.mxu1 %v2424_v62 }
  0xb6   :  { %573 = vmatpush.msra.mxu2 %v2406_v55  ;;  %593 = vmatpush.msra.mxu3 %v2408_v56 }
  0xb7   :  { %613 = vmatpush.msrb.mxu0 %v3530_v1  ;;  %633 = vmatpush.msrb.mxu1 %v3531_v48 }
  0xb8   :  { %574 = vmatpush.msra.mxu2 %v3532_v47  ;;  %594 = vmatpush.msra.mxu3 %v3533_v58 }
  0xb9   :  { %614 = vmatpush.msrb.mxu0 %v3534_v51  ;;  %634 = vmatpush.msrb.mxu1 %v2444_v5 }
  0xba   :  { %575 = vmatpush.msra.mxu2 %v2430_v63  ;;  %595 = vmatpush.msra.mxu3 %v2432_v0 }
  0xbb   :  { %615 = vmatpush.msrb.mxu0 %v2450_v6  ;;  %635 = vmatpush.msrb.mxu1 %v2452_v59 }
  0xbc   :  { %496 = vmatmul.f32.vlgmr.msrb.gmra.mxu2 %v257_v57  ;;  %516 = vmatmul.f32.vlgmr.msrb.gmra.mxu3 %v257_v57 }
  0xbd   :  { %536 = vmatmul.f32.vlgmr.msra.gmra.mxu0 %v257_v57  ;;  %556 = vmatmul.f32.vlgmr.msra.gmra.mxu1 %v257_v57  ;;  %v122_v57 = vperm.slane %v2529_v3, 2 }
  0xbe   :  { %640 = vmatpush.msrb.mxu2 %v2262_v7  ;;  %660 = vmatpush.msrb.mxu3 %v2264_v8 }
  0xbf   :  { %680 = vmatpush.msra.mxu0 %v2278_v13  ;;  %700 = vmatpush.msra.mxu1 %v2280_v14 }
  0xc0   :  { %641 = vmatpush.msrb.mxu2 %v2266_v9  ;;  %661 = vmatpush.msrb.mxu3 %v2268_v10 }
  0xc1   :  { %681 = vmatpush.msra.mxu0 %v2292_v17  ;;  %701 = vmatpush.msra.mxu1 %v2294_v18 }
  0xc2   :  { %642 = vmatpush.msrb.mxu2 %v2272_v11  ;;  %662 = vmatpush.msrb.mxu3 %v2274_v12 }
  0xc3   :  { %682 = vmatpush.msra.mxu0 %v2302_v21  ;;  %702 = vmatpush.msra.mxu1 %v2304_v22 }
  0xc4   :  { %643 = vmatpush.msrb.mxu2 %v2284_v15  ;;  %663 = vmatpush.msrb.mxu3 %v2286_v16 }
  0xc5   :  { %683 = vmatpush.msra.mxu0 %v2314_v25  ;;  %703 = vmatpush.msra.mxu1 %v2316_v26 }
  0xc6   :  { %644 = vmatpush.msrb.mxu2 %v2298_v19  ;;  %664 = vmatpush.msrb.mxu3 %v2300_v20 }
  0xc7   :  { %684 = vmatpush.msra.mxu0 %v2326_v29  ;;  %704 = vmatpush.msra.mxu1 %v2328_v30 }
  0xc8   :  { %645 = vmatpush.msrb.mxu2 %v2310_v23  ;;  %665 = vmatpush.msrb.mxu3 %v2312_v24 }
  0xc9   :  { %685 = vmatpush.msra.mxu0 %v2338_v33  ;;  %705 = vmatpush.msra.mxu1 %v2340_v34 }
  0xca   :  { %646 = vmatpush.msrb.mxu2 %v2322_v27  ;;  %666 = vmatpush.msrb.mxu3 %v2324_v28 }
  0xcb   :  { %686 = vmatpush.msra.mxu0 %v2350_v37  ;;  %706 = vmatpush.msra.mxu1 %v2352_v38 }
  0xcc   :  { %647 = vmatpush.msrb.mxu2 %v2334_v31  ;;  %667 = vmatpush.msrb.mxu3 %v2336_v32 }
  0xcd   :  { %687 = vmatpush.msra.mxu0 %v2362_v41  ;;  %707 = vmatpush.msra.mxu1 %v2364_v42 }
  0xce   :  { %648 = vmatpush.msrb.mxu2 %v2346_v35  ;;  %668 = vmatpush.msrb.mxu3 %v2348_v36 }
  0xcf   :  { %688 = vmatpush.msra.mxu0 %v2374_v45  ;;  %708 = vmatpush.msra.mxu1 %v2376_v46 }
  0xd0   :  { %649 = vmatpush.msrb.mxu2 %v2358_v39  ;;  %669 = vmatpush.msrb.mxu3 %v2360_v40  ;;  %v3537_v40 = vld [vmem:[#allocation22_spill] sm:$0xff] }
  0xd1   :  { %689 = vmatpush.msra.mxu0 %v2386_v49  ;;  %709 = vmatpush.msra.mxu1 %v2388_v50  ;;  %v3538_v49 = vld [vmem:[#allocation23_spill] sm:$0xff]  ;;  %v3539_v50 = vld [vmem:[#allocation21_spill] sm:$0xff] }
  0xd2   :  { %650 = vmatpush.msrb.mxu2 %v2370_v43  ;;  %670 = vmatpush.msrb.mxu3 %v2372_v44  ;;  %v194_v44 = vadd.f32 %v193_v60, %v122_v57  ;;  %v3542_v57 = vld [vmem:[#allocation20_spill] sm:$0xff]  ;;  %v3543_v60 = vld [vmem:[#allocation15_spill] sm:$0xff] }
  0xd3   :  { %690 = vmatpush.msra.mxu0 %v2398_v53  ;;  %710 = vmatpush.msra.mxu1 %v2400_v54 }
  0xd4   :  { %651 = vmatpush.msrb.mxu2 %v3535_v2  ;;  %671 = vmatpush.msrb.mxu3 %v3536_v4 }
  0xd5   :  { %691 = vmatpush.msra.mxu0 %v3537_v40  ;;  %711 = vmatpush.msra.mxu1 %v3538_v49  ;;  %v258_v40 = vmax.f32 %v194_v44, 0.0  ;;  %v3541_v44 = vld [vmem:[#allocation19_spill] sm:$0xff] }
  0xd6   :  { %652 = vmatpush.msrb.mxu2 %v3539_v50  ;;  %672 = vmatpush.msrb.mxu3 %v2396_v52 }
  0xd7   :  { %692 = vmatpush.msra.mxu0 %v2422_v61  ;;  %712 = vmatpush.msra.mxu1 %v2424_v62 }
  0xd8   :  { %653 = vmatpush.msrb.mxu2 %v2406_v55  ;;  %673 = vmatpush.msrb.mxu3 %v2408_v56 }
  0xd9   :  { %693 = vmatpush.msra.mxu0 %v3530_v1  ;;  %713 = vmatpush.msra.mxu1 %v3531_v48 }
  0xda   :  { %654 = vmatpush.msrb.mxu2 %v3532_v47  ;;  %674 = vmatpush.msrb.mxu3 %v3533_v58 }
  0xdb   :  { %694 = vmatpush.msra.mxu0 %v3534_v51  ;;  %714 = vmatpush.msra.mxu1 %v2444_v5 }
  0xdc   :  { %655 = vmatpush.msrb.mxu2 %v2430_v63  ;;  %675 = vmatpush.msrb.mxu3 %v2432_v0 }
  0xdd   :  { %695 = vmatpush.msra.mxu0 %v2450_v6  ;;  %715 = vmatpush.msra.mxu1 %v2452_v59 }
  0xde   :  { %576 = vmatmul.f32.vlgmr.msra.gmra.mxu2 %v258_v40  ;;  %596 = vmatmul.f32.vlgmr.msra.gmra.mxu3 %v258_v40 }
  0xdf   :  { %616 = vmatmul.f32.vlgmr.msrb.gmra.mxu0 %v258_v40  ;;  %636 = vmatmul.f32.vlgmr.msrb.gmra.mxu1 %v258_v40  ;;  %v3540_v40 = vld [vmem:[#allocation14_spill] sm:$0xff] }
  0xe0   :  { %720 = vmatpush.msra.mxu2 %v2262_v7  ;;  %740 = vmatpush.msra.mxu3 %v2264_v8 }
  0xe1   :  { %760 = vmatpush.msrb.mxu0 %v2278_v13  ;;  %780 = vmatpush.msrb.mxu1 %v2280_v14 }
  0xe2   :  { %721 = vmatpush.msra.mxu2 %v2266_v9  ;;  %741 = vmatpush.msra.mxu3 %v2268_v10 }
  0xe3   :  { %761 = vmatpush.msrb.mxu0 %v2292_v17  ;;  %781 = vmatpush.msrb.mxu1 %v2294_v18 }
  0xe4   :  { %722 = vmatpush.msra.mxu2 %v2272_v11  ;;  %742 = vmatpush.msra.mxu3 %v2274_v12 }
  0xe5   :  { %762 = vmatpush.msrb.mxu0 %v2302_v21  ;;  %782 = vmatpush.msrb.mxu1 %v2304_v22 }
  0xe6   :  { %723 = vmatpush.msra.mxu2 %v2284_v15  ;;  %743 = vmatpush.msra.mxu3 %v2286_v16 }
  0xe7   :  { %763 = vmatpush.msrb.mxu0 %v2314_v25  ;;  %783 = vmatpush.msrb.mxu1 %v2316_v26 }
  0xe8   :  { %724 = vmatpush.msra.mxu2 %v2298_v19  ;;  %744 = vmatpush.msra.mxu3 %v2300_v20 }
  0xe9   :  { %764 = vmatpush.msrb.mxu0 %v2326_v29  ;;  %784 = vmatpush.msrb.mxu1 %v2328_v30 }
  0xea   :  { %725 = vmatpush.msra.mxu2 %v2310_v23  ;;  %745 = vmatpush.msra.mxu3 %v2312_v24 }
  0xeb   :  { %765 = vmatpush.msrb.mxu0 %v2338_v33  ;;  %785 = vmatpush.msrb.mxu1 %v2340_v34 }
  0xec   :  { %726 = vmatpush.msra.mxu2 %v2322_v27  ;;  %746 = vmatpush.msra.mxu3 %v2324_v28 }
  0xed   :  { %766 = vmatpush.msrb.mxu0 %v2350_v37  ;;  %786 = vmatpush.msrb.mxu1 %v2352_v38 }
  0xee   :  { %727 = vmatpush.msra.mxu2 %v2334_v31  ;;  %747 = vmatpush.msra.mxu3 %v2336_v32 }
  0xef   :  { %767 = vmatpush.msrb.mxu0 %v2362_v41  ;;  %787 = vmatpush.msrb.mxu1 %v2364_v42 }
  0xf0   :  { %728 = vmatpush.msra.mxu2 %v2346_v35  ;;  %748 = vmatpush.msra.mxu3 %v2348_v36  ;;  %v123_v35 = vperm.slane %v2529_v3, 3 }
  0xf1   :  { %768 = vmatpush.msrb.mxu0 %v2374_v45  ;;  %788 = vmatpush.msrb.mxu1 %v2376_v46  ;;  %v213_v45 = vpop.f32.mrf.mxu1 }
  0xf2   :  { %729 = vmatpush.msra.mxu2 %v2358_v39  ;;  %749 = vmatpush.msra.mxu3 %v3540_v40  ;;  %v3544_v40 = vld [vmem:[#allocation22_spill] sm:$0xff] }
  0xf3   :  { %769 = vmatpush.msrb.mxu0 %v3541_v44  ;;  %789 = vmatpush.msrb.mxu1 %v3542_v57 }
  0xf4   :  { %730 = vmatpush.msra.mxu2 %v2370_v43  ;;  %750 = vmatpush.msra.mxu3 %v3543_v60  ;;  %v214_v60 = vadd.f32 %v213_v45, %v123_v35  ;;  %v2833_v35 = vld [vmem:[#allocation6 + $0x198] sm:$0xff] }
  0xf5   :  { %770 = vmatpush.msrb.mxu0 %v2398_v53  ;;  %790 = vmatpush.msrb.mxu1 %v2400_v54  ;;  %v2857_v45 = vld [vmem:[#allocation6 + $0x158] sm:$0xff] }
  0xf6   :  { %731 = vmatpush.msra.mxu2 %v3535_v2  ;;  %751 = vmatpush.msra.mxu3 %v3536_v4 }
  0xf7   :  { %771 = vmatpush.msrb.mxu0 %v3544_v40  ;;  %791 = vmatpush.msrb.mxu1 %v3538_v49  ;;  %v259_v40 = vmax.f32 %v214_v60, 0.0  ;;  %v2939_v60 = vld [vmem:[#allocation6 + $0x70] sm:$0xff] }
  0xf8   :  { %732 = vmatpush.msra.mxu2 %v3539_v50  ;;  %752 = vmatpush.msra.mxu3 %v2396_v52 }
  0xf9   :  { %772 = vmatpush.msrb.mxu0 %v2422_v61  ;;  %792 = vmatpush.msrb.mxu1 %v2424_v62 }
  0xfa   :  { %733 = vmatpush.msra.mxu2 %v2406_v55  ;;  %753 = vmatpush.msra.mxu3 %v2408_v56 }
  0xfb   :  { %773 = vmatpush.msrb.mxu0 %v3530_v1  ;;  %793 = vmatpush.msrb.mxu1 %v3531_v48 }
  0xfc   :  { %734 = vmatpush.msra.mxu2 %v3532_v47  ;;  %754 = vmatpush.msra.mxu3 %v3533_v58 }
  0xfd   :  { %774 = vmatpush.msrb.mxu0 %v3534_v51  ;;  %794 = vmatpush.msrb.mxu1 %v2444_v5 }
  0xfe   :  { %735 = vmatpush.msra.mxu2 %v2430_v63  ;;  %755 = vmatpush.msra.mxu3 %v2432_v0 }
  0xff   :  { %775 = vmatpush.msrb.mxu0 %v2450_v6  ;;  %795 = vmatpush.msrb.mxu1 %v2452_v59 }
 0x100   :  { %656 = vmatmul.f32.vlgmr.msrb.gmra.mxu2 %v259_v40  ;;  %676 = vmatmul.f32.vlgmr.msrb.gmra.mxu3 %v259_v40 }
 0x101   :  { %696 = vmatmul.f32.vlgmr.msra.gmra.mxu0 %v259_v40  ;;  %716 = vmatmul.f32.vlgmr.msra.gmra.mxu1 %v259_v40  ;;  %v2929_v40 = vld [vmem:[#allocation6 + $0x98] sm:$0xff] }
 0x102   :  { %800 = vmatpush.msrb.mxu2 %v2262_v7  ;;  %820 = vmatpush.msrb.mxu3 %v2264_v8  ;;  %v124_v7 = vperm.slane %v2529_v3, 4  ;;  %v233_v8 = vpop.f32.mrf.mxu0  ;;  %3560 = vst [vmem:[#allocation20_spill] sm:$0xff] %v2929_v40 }
 0x103   :  { %840 = vmatpush.msra.mxu0 %v2278_v13  ;;  %860 = vmatpush.msra.mxu1 %v2280_v14  ;;  %v3548_v14 = vld [vmem:[#allocation15_spill] sm:$0xff] }
 0x104   :  { %801 = vmatpush.msrb.mxu2 %v2266_v9  ;;  %821 = vmatpush.msrb.mxu3 %v2268_v10  ;;  %v3545_v9 = vld [vmem:[#allocation13_spill] sm:$0xff]  ;;  %v234_v10 = vadd.f32 %v233_v8, %v124_v7  ;;  %v2941_v7 = vld [vmem:[#allocation6 + $0x78] sm:$0xff] }
 0x105   :  { %841 = vmatpush.msra.mxu0 %v2292_v17  ;;  %861 = vmatpush.msra.mxu1 %v2294_v18  ;;  %v253_v17 = vpop.f32.mrf.mxu1  ;;  %3564 = vst [vmem:[#allocation15_spill] sm:$0xff] %v2941_v7  ;;  %v2945_v8 = vld [vmem:[#allocation6 + $0x40] sm:$0xff] }
 0x106   :  { %802 = vmatpush.msrb.mxu2 %v2272_v11  ;;  %822 = vmatpush.msrb.mxu3 %v2274_v12  ;;  %v3546_v11 = vld [vmem:[#allocation16_spill] sm:$0xff]  ;;  %v3547_v12 = vld [vmem:[#allocation14_spill] sm:$0xff]  ;;  %v260_v13 = vmax.f32 %v234_v10, 0.0  ;;  %v2951_v10 = vld [vmem:[#allocation6 + $0x50] sm:$0xff] }
 0x107   :  { %842 = vmatpush.msra.mxu0 %v2302_v21  ;;  %862 = vmatpush.msra.mxu1 %v2304_v22  ;;  %v2795_v22 = vld [vmem:[#allocation6 + $0x1f0] sm:$0xff]  ;;  %3563 = vst [vmem:[#allocation14_spill] sm:$0xff] %v2939_v60 }
 0x108   :  { %803 = vmatpush.msrb.mxu2 %v2284_v15  ;;  %823 = vmatpush.msrb.mxu3 %v2286_v16  ;;  %v3549_v15 = vld [vmem:[#allocation22_spill] sm:$0xff]  ;;  %v125_v16 = vperm.slane %v2529_v3, 5  ;;  %3567 = vst [vmem:[#allocation30_spill] sm:$0xff] %v2951_v10 }
 0x109   :  { %843 = vmatpush.msra.mxu0 %v2314_v25  ;;  %863 = vmatpush.msra.mxu1 %v2316_v26  ;;  %v2807_v25 = vld [vmem:[#allocation6 + $0x1c8] sm:$0xff]  ;;  %v2809_v26 = vld [vmem:[#allocation6 + $0x1d0] sm:$0xff]  ;;  %3565 = vst [vmem:[#allocation22_spill] sm:$0xff] %v2945_v8 }
 0x10a   :  { %804 = vmatpush.msrb.mxu2 %v2298_v19  ;;  %824 = vmatpush.msrb.mxu3 %v2300_v20  ;;  %v254_v18 = vadd.f32 %v253_v17, %v125_v16  ;;  %v2789_v19 = vld [vmem:[#allocation6 + $0x1e0] sm:$0xff]  ;;  %v2791_v20 = vld [vmem:[#allocation6 + $0x1e8] sm:$0xff] }
 0x10b   :  { %844 = vmatpush.msra.mxu0 %v2326_v29  ;;  %864 = vmatpush.msra.mxu1 %v2328_v30  ;;  %v2815_v29 = vld [vmem:[#allocation6 + $0x1a8] sm:$0xff]  ;;  %v2819_v30 = vld [vmem:[#allocation6 + $0x1b0] sm:$0xff]  ;;  %v2969_v16 = vld [vmem:[#allocation6] sm:$0xff] }
 0x10c   :  { %805 = vmatpush.msrb.mxu2 %v2310_v23  ;;  %825 = vmatpush.msrb.mxu3 %v2312_v24  ;;  %v261_v21 = vmax.f32 %v254_v18, 0.0  ;;  %v2797_v23 = vld [vmem:[#allocation6 + $0x1f8] sm:$0xff]  ;;  %v2805_v24 = vld [vmem:[#allocation6 + $0x1c0] sm:$0xff]  ;;  %v2911_v3 = vld [vmem:[#allocation6 + $0xa8] sm:$0xff]  ;;  %3573 = vst [vmem:[#allocation36_spill] sm:$0xff] %v2969_v16 }
 0x10d   :  { %845 = vmatpush.msra.mxu0 %v2338_v33  ;;  %865 = vmatpush.msra.mxu1 %v2340_v34  ;;  %v2827_v33 = vld [vmem:[#allocation6 + $0x188] sm:$0xff]  ;;  %v2831_v34 = vld [vmem:[#allocation6 + $0x190] sm:$0xff]  ;;  %3554 = vst [vmem:[#allocation28_spill] sm:$0xff] %v2911_v3 }
 0x10e   :  { %806 = vmatpush.msrb.mxu2 %v2322_v27  ;;  %826 = vmatpush.msrb.mxu3 %v2324_v28  ;;  %v2811_v27 = vld [vmem:[#allocation6 + $0x1d8] sm:$0xff]  ;;  %v2813_v28 = vld [vmem:[#allocation6 + $0x1a0] sm:$0xff]  ;;  %v2971_v17 = vld [vmem:[#allocation6 + $0x8] sm:$0xff] }
 0x10f   :  { %846 = vmatpush.msra.mxu0 %v2350_v37  ;;  %866 = vmatpush.msra.mxu1 %v2352_v38  ;;  %v2839_v37 = vld [vmem:[#allocation6 + $0x168] sm:$0xff]  ;;  %v2843_v38 = vld [vmem:[#allocation6 + $0x170] sm:$0xff]  ;;  %3574 = vst [vmem:[#allocation37_spill] sm:$0xff] %v2971_v17 }
 0x110   :  { %807 = vmatpush.msrb.mxu2 %v2334_v31  ;;  %827 = vmatpush.msrb.mxu3 %v2336_v32  ;;  %v2821_v31 = vld [vmem:[#allocation6 + $0x1b8] sm:$0xff]  ;;  %v2825_v32 = vld [vmem:[#allocation6 + $0x180] sm:$0xff]  ;;  %v2975_v18 = vld [vmem:[#allocation6 + $0x10] sm:$0xff] }
 0x111   :  { %847 = vmatpush.msra.mxu0 %v2362_v41  ;;  %867 = vmatpush.msra.mxu1 %v2364_v42  ;;  %v2849_v41 = vld [vmem:[#allocation6 + $0x140] sm:$0xff]  ;;  %v2851_v42 = vld [vmem:[#allocation6 + $0x148] sm:$0xff]  ;;  %3575 = vst [vmem:[#allocation38_spill] sm:$0xff] %v2975_v18 }
 0x112   :  { %808 = vmatpush.msrb.mxu2 %v3545_v9  ;;  %828 = vmatpush.msrb.mxu3 %v2348_v36  ;;  %v2837_v36 = vld [vmem:[#allocation6 + $0x160] sm:$0xff]  ;;  %v2947_v9 = vld [vmem:[#allocation6 + $0x48] sm:$0xff] }
 0x113   :  { %848 = vmatpush.msra.mxu0 %v3546_v11  ;;  %868 = vmatpush.msra.mxu1 %v2376_v46  ;;  %v2861_v46 = vld [vmem:[#allocation6 + $0x120] sm:$0xff]  ;;  %3566 = vst [vmem:[#allocation29_spill] sm:$0xff] %v2947_v9  ;;  %v2953_v11 = vld [vmem:[#allocation6 + $0x58] sm:$0xff] }
 0x114   :  { %809 = vmatpush.msrb.mxu2 %v2358_v39  ;;  %829 = vmatpush.msrb.mxu3 %v3547_v12  ;;  %v2845_v39 = vld [vmem:[#allocation6 + $0x178] sm:$0xff]  ;;  %3568 = vst [vmem:[#allocation31_spill] sm:$0xff] %v2953_v11  ;;  %v2957_v12 = vld [vmem:[#allocation6 + $0x20] sm:$0xff] }
 0x115   :  { %849 = vmatpush.msra.mxu0 %v3541_v44  ;;  %869 = vmatpush.msra.mxu1 %v3542_v57  ;;  %v2933_v44 = vld [vmem:[#allocation6 + $0x60] sm:$0xff]  ;;  %v2935_v57 = vld [vmem:[#allocation6 + $0x68] sm:$0xff]  ;;  %3569 = vst [vmem:[#allocation32_spill] sm:$0xff] %v2957_v12 }
 0x116   :  { %810 = vmatpush.msrb.mxu2 %v2370_v43  ;;  %830 = vmatpush.msrb.mxu3 %v3548_v14  ;;  %v2855_v43 = vld [vmem:[#allocation6 + $0x150] sm:$0xff]  ;;  %3561 = vst [vmem:[#allocation13_spill] sm:$0xff] %v2933_v44 }
 0x117   :  { %850 = vmatpush.msra.mxu0 %v2398_v53  ;;  %870 = vmatpush.msra.mxu1 %v2400_v54  ;;  %v2881_v53 = vld [vmem:[#allocation6 + $0x118] sm:$0xff]  ;;  %v2885_v54 = vld [vmem:[#allocation6 + $0xe0] sm:$0xff]  ;;  %3562 = vst [vmem:[#allocation16_spill] sm:$0xff] %v2935_v57  ;;  %v2963_v14 = vld [vmem:[#allocation6 + $0x30] sm:$0xff] }
 0x118   :  { %811 = vmatpush.msrb.mxu2 %v3535_v2  ;;  %831 = vmatpush.msrb.mxu3 %v3536_v4  ;;  %v2923_v2 = vld [vmem:[#allocation6 + $0x88] sm:$0xff]  ;;  %v2927_v4 = vld [vmem:[#allocation6 + $0x90] sm:$0xff]  ;;  %3571 = vst [vmem:[#allocation34_spill] sm:$0xff] %v2963_v14 }
 0x119   :  { %851 = vmatpush.msra.mxu0 %v3549_v15  ;;  %871 = vmatpush.msra.mxu1 %v3538_v49  ;;  %v2869_v49 = vld [vmem:[#allocation6 + $0x138] sm:$0xff]  ;;  %3558 = vst [vmem:[#allocation21_spill] sm:$0xff] %v2923_v2 }
 0x11a   :  { %736 = vmatmul.f32.vlgmr.msra.gmra.mxu2 %v260_v13  ;;  %756 = vmatmul.f32.vlgmr.msra.gmra.mxu3 %v260_v13  ;;  %3559 = vst [vmem:[#allocation19_spill] sm:$0xff] %v2927_v4  ;;  %v2965_v15 = vld [vmem:[#allocation6 + $0x38] sm:$0xff] }
 0x11b   :  { %776 = vmatmul.f32.vlgmr.msrb.gmra.mxu0 %v260_v13  ;;  %796 = vmatmul.f32.vlgmr.msrb.gmra.mxu1 %v260_v13  ;;  %v2959_v13 = vld [vmem:[#allocation6 + $0x28] sm:$0xff]  ;;  %3572 = vst [vmem:[#allocation35_spill] sm:$0xff] %v2965_v15 }
 0x11c   :  { %812 = vmatpush.msrb.mxu2 %v3539_v50  ;;  %832 = vmatpush.msrb.mxu3 %v2396_v52  ;;  %v2873_v50 = vld [vmem:[#allocation6 + $0x100] sm:$0xff]  ;;  %v2879_v52 = vld [vmem:[#allocation6 + $0x110] sm:$0xff]  ;;  %3570 = vst [vmem:[#allocation33_spill] sm:$0xff] %v2959_v13 }
 0x11d   :  { %852 = vmatpush.msra.mxu0 %v2422_v61  ;;  %872 = vmatpush.msra.mxu1 %v2424_v62  ;;  %v2899_v61 = vld [vmem:[#allocation6 + $0xc8] sm:$0xff]  ;;  %v2903_v62 = vld [vmem:[#allocation6 + $0xd0] sm:$0xff] }
 0x11e   :  { %813 = vmatpush.msrb.mxu2 %v2406_v55  ;;  %833 = vmatpush.msrb.mxu3 %v2408_v56  ;;  %v2887_v55 = vld [vmem:[#allocation6 + $0xe8] sm:$0xff]  ;;  %v2891_v56 = vld [vmem:[#allocation6 + $0xf0] sm:$0xff]  ;;  %3550 = vst [vmem:[#allocation26_spill] sm:$0xff] %v2899_v61 }
 0x11f   :  { %853 = vmatpush.msra.mxu0 %v3530_v1  ;;  %873 = vmatpush.msra.mxu1 %v3531_v48  ;;  %v2867_v48 = vld [vmem:[#allocation6 + $0x130] sm:$0xff]  ;;  %3551 = vst [vmem:[#allocation27_spill] sm:$0xff] %v2903_v62  ;;  %v2921_v1 = vld [vmem:[#allocation6 + $0x80] sm:$0xff] }
 0x120   :  { %814 = vmatpush.msrb.mxu2 %v3532_v47  ;;  %834 = vmatpush.msrb.mxu3 %v3533_v58  ;;  %v2863_v47 = vld [vmem:[#allocation6 + $0x128] sm:$0xff]  ;;  %v2893_v58 = vld [vmem:[#allocation6 + $0xf8] sm:$0xff]  ;;  %3557 = vst [vmem:[#allocation23_spill] sm:$0xff] %v2921_v1 }
 0x121   :  { %854 = vmatpush.msra.mxu0 %v3534_v51  ;;  %874 = vmatpush.msra.mxu1 %v2444_v5  ;;  %v2875_v51 = vld [vmem:[#allocation6 + $0x108] sm:$0xff]  ;;  %v2915_v5 = vld [vmem:[#allocation6 + $0xb0] sm:$0xff] }
 0x122   :  { %815 = vmatpush.msrb.mxu2 %v2430_v63  ;;  %835 = vmatpush.msrb.mxu3 %v2432_v0  ;;  %v2905_v63 = vld [vmem:[#allocation6 + $0xd8] sm:$0xff]  ;;  %v2909_v0 = vld [vmem:[#allocation6 + $0xa0] sm:$0xff]  ;;  %3555 = vst [vmem:[#allocation17_spill] sm:$0xff] %v2915_v5 }
 0x123   :  { %855 = vmatpush.msra.mxu0 %v2450_v6  ;;  %875 = vmatpush.msra.mxu1 %v2452_v59  ;;  %v2897_v59 = vld [vmem:[#allocation6 + $0xc0] sm:$0xff]  ;;  %3552 = vst [vmem:[#allocation24_spill] sm:$0xff] %v2905_v63  ;;  %v2917_v6 = vld [vmem:[#allocation6 + $0xb8] sm:$0xff] }
 0x124   :  { %880 = vmatpush.msra.mxu2 %v2789_v19  ;;  %900 = vmatpush.msra.mxu3 %v2791_v20  ;;  %3553 = vst [vmem:[#allocation25_spill] sm:$0xff] %v2909_v0 }
 0x125   :  { %920 = vmatpush.msrb.mxu0 %v2795_v22  ;;  %940 = vmatpush.msrb.mxu1 %v2797_v23  ;;  %3556 = vst [vmem:[#allocation18_spill] sm:$0xff] %v2917_v6 }
 0x126   :  { %816 = vmatmul.f32.vlgmr.msrb.gmra.mxu2 %v261_v21  ;;  %836 = vmatmul.f32.vlgmr.msrb.gmra.mxu3 %v261_v21 }
 0x127   :  { %856 = vmatmul.f32.vlgmr.msra.gmra.mxu0 %v261_v21  ;;  %876 = vmatmul.f32.vlgmr.msra.gmra.mxu1 %v261_v21  ;;  %v2977_v21 = vld [vmem:[#allocation6 + $0x18] sm:$0xff] }
 0x128   :  { %881 = vmatpush.msra.mxu2 %v2805_v24  ;;  %901 = vmatpush.msra.mxu3 %v2807_v25  ;;  %3576 = vst [vmem:[#allocation39_spill] sm:$0xff] %v2977_v21 }
 0x129   :  { %921 = vmatpush.msrb.mxu0 %v2809_v26  ;;  %941 = vmatpush.msrb.mxu1 %v2811_v27 }
 0x12a   :  { %882 = vmatpush.msra.mxu2 %v2813_v28  ;;  %902 = vmatpush.msra.mxu3 %v2815_v29 }
 0x12b   :  { %922 = vmatpush.msrb.mxu0 %v2819_v30  ;;  %942 = vmatpush.msrb.mxu1 %v2821_v31 }
 0x12c   :  { %883 = vmatpush.msra.mxu2 %v2825_v32  ;;  %903 = vmatpush.msra.mxu3 %v2827_v33 }
 0x12d   :  { %923 = vmatpush.msrb.mxu0 %v2831_v34  ;;  %943 = vmatpush.msrb.mxu1 %v2833_v35 }
 0x12e   :  { %884 = vmatpush.msra.mxu2 %v2837_v36  ;;  %904 = vmatpush.msra.mxu3 %v2839_v37 }
 0x12f   :  { %924 = vmatpush.msrb.mxu0 %v2843_v38  ;;  %944 = vmatpush.msrb.mxu1 %v2845_v39 }
 0x130   :  { %885 = vmatpush.msra.mxu2 %v2849_v41  ;;  %905 = vmatpush.msra.mxu3 %v2851_v42 }
 0x131   :  { %925 = vmatpush.msrb.mxu0 %v2855_v43  ;;  %945 = vmatpush.msrb.mxu1 %v2857_v45 }
 0x132   :  { %886 = vmatpush.msra.mxu2 %v2861_v46  ;;  %906 = vmatpush.msra.mxu3 %v2863_v47 }
 0x133   :  { %926 = vmatpush.msrb.mxu0 %v2867_v48  ;;  %946 = vmatpush.msrb.mxu1 %v2869_v49 }
 0x134   :  { %887 = vmatpush.msra.mxu2 %v2873_v50  ;;  %907 = vmatpush.msra.mxu3 %v2875_v51 }
 0x135   :  { %927 = vmatpush.msrb.mxu0 %v2879_v52  ;;  %947 = vmatpush.msrb.mxu1 %v2881_v53 }
 0x136   :  { %888 = vmatpush.msra.mxu2 %v2885_v54  ;;  %908 = vmatpush.msra.mxu3 %v2887_v55 }
 0x137   :  { %928 = vmatpush.msrb.mxu0 %v2891_v56  ;;  %948 = vmatpush.msrb.mxu1 %v2893_v58 }
 0x138   :  { %889 = vmatpush.msra.mxu2 %v2897_v59  ;;  %909 = vmatpush.msra.mxu3 %v2899_v61 }
 0x139   :  { %929 = vmatpush.msrb.mxu0 %v2903_v62  ;;  %949 = vmatpush.msrb.mxu1 %v2905_v63 }
 0x13a   :  { %890 = vmatpush.msra.mxu2 %v2909_v0  ;;  %910 = vmatpush.msra.mxu3 %v2911_v3 }
 0x13b   :  { %930 = vmatpush.msrb.mxu0 %v2915_v5  ;;  %950 = vmatpush.msrb.mxu1 %v2917_v6 }
 0x13c   :  { %891 = vmatpush.msra.mxu2 %v2921_v1  ;;  %911 = vmatpush.msra.mxu3 %v2923_v2 }
 0x13d   :  { %931 = vmatpush.msrb.mxu0 %v2927_v4  ;;  %951 = vmatpush.msrb.mxu1 %v2929_v40 }
 0x13e   :  { %892 = vmatpush.msra.mxu2 %v2933_v44  ;;  %912 = vmatpush.msra.mxu3 %v2935_v57 }
 0x13f   :  { %932 = vmatpush.msrb.mxu0 %v2939_v60  ;;  %952 = vmatpush.msrb.mxu1 %v2941_v7 }
 0x140   :  { %893 = vmatpush.msra.mxu2 %v2945_v8  ;;  %913 = vmatpush.msra.mxu3 %v2947_v9 }
 0x141   :  { %933 = vmatpush.msrb.mxu0 %v2951_v10  ;;  %953 = vmatpush.msrb.mxu1 %v2953_v11  ;;  %v2182_v11 = vmov 0.0  }
 0x142   :  { %894 = vmatpush.msra.mxu2 %v2957_v12  ;;  %914 = vmatpush.msra.mxu3 %v2959_v13 }
 0x143   :  { %934 = vmatpush.msrb.mxu0 %v2963_v14  ;;  %954 = vmatpush.msrb.mxu1 %v2965_v15 }
 0x144   :  { %895 = vmatpush.msra.mxu2 %v2969_v16  ;;  %915 = vmatpush.msra.mxu3 %v2971_v17 }
 0x145   :  { %935 = vmatpush.msrb.mxu0 %v2975_v18  ;;  %955 = vmatpush.msrb.mxu1 %v2977_v21 }
 0x146   :  { %896 = vmatmul.f32.vlgmr.msra.gmra.mxu2 %v2182_v11  ;;  %916 = vmatmul.f32.vlgmr.msra.gmra.mxu3 %v2182_v11 }
 0x147   :  { %936 = vmatmul.f32.vlgmr.msrb.gmra.mxu0 %v2182_v11  ;;  %956 = vmatmul.f32.vlgmr.msrb.gmra.mxu1 %v2182_v11  ;;  %v3577_v11 = vld [vmem:[#allocation31_spill] sm:$0xff] }
 0x148   :  { %1027 = vmatpush.msrb.mxu2 %v2789_v19  ;;  %1047 = vmatpush.msrb.mxu3 %v2791_v20 }
 0x149   :  { %1067 = vmatpush.msra.mxu0 %v2795_v22  ;;  %1087 = vmatpush.msra.mxu1 %v2797_v23 }
 0x14a   :  { %1028 = vmatpush.msrb.mxu2 %v2805_v24  ;;  %1048 = vmatpush.msrb.mxu3 %v2807_v25 }
 0x14b   :  { %1068 = vmatpush.msra.mxu0 %v2809_v26  ;;  %1088 = vmatpush.msra.mxu1 %v2811_v27 }
 0x14c   :  { %1029 = vmatpush.msrb.mxu2 %v2813_v28  ;;  %1049 = vmatpush.msrb.mxu3 %v2815_v29 }
 0x14d   :  { %1069 = vmatpush.msra.mxu0 %v2819_v30  ;;  %1089 = vmatpush.msra.mxu1 %v2821_v31 }
 0x14e   :  { %1030 = vmatpush.msrb.mxu2 %v2825_v32  ;;  %1050 = vmatpush.msrb.mxu3 %v2827_v33 }
 0x14f   :  { %1070 = vmatpush.msra.mxu0 %v2831_v34  ;;  %1090 = vmatpush.msra.mxu1 %v2833_v35 }
 0x150   :  { %1031 = vmatpush.msrb.mxu2 %v2837_v36  ;;  %1051 = vmatpush.msrb.mxu3 %v2839_v37 }
 0x151   :  { %1071 = vmatpush.msra.mxu0 %v2843_v38  ;;  %1091 = vmatpush.msra.mxu1 %v2845_v39 }
 0x152   :  { %1032 = vmatpush.msrb.mxu2 %v2849_v41  ;;  %1052 = vmatpush.msrb.mxu3 %v2851_v42 }
 0x153   :  { %1072 = vmatpush.msra.mxu0 %v2855_v43  ;;  %1092 = vmatpush.msra.mxu1 %v2857_v45 }
 0x154   :  { %1033 = vmatpush.msrb.mxu2 %v2861_v46  ;;  %1053 = vmatpush.msrb.mxu3 %v2863_v47 }
 0x155   :  { %1073 = vmatpush.msra.mxu0 %v2867_v48  ;;  %1093 = vmatpush.msra.mxu1 %v2869_v49 }
 0x156   :  { %1034 = vmatpush.msrb.mxu2 %v2873_v50  ;;  %1054 = vmatpush.msrb.mxu3 %v2875_v51 }
 0x157   :  { %1074 = vmatpush.msra.mxu0 %v2879_v52  ;;  %1094 = vmatpush.msra.mxu1 %v2881_v53 }
 0x158   :  { %1035 = vmatpush.msrb.mxu2 %v2885_v54  ;;  %1055 = vmatpush.msrb.mxu3 %v2887_v55 }
 0x159   :  { %1075 = vmatpush.msra.mxu0 %v2891_v56  ;;  %1095 = vmatpush.msra.mxu1 %v2893_v58 }
 0x15a   :  { %1036 = vmatpush.msrb.mxu2 %v2897_v59  ;;  %1056 = vmatpush.msrb.mxu3 %v2899_v61 }
 0x15b   :  { %1076 = vmatpush.msra.mxu0 %v2903_v62  ;;  %1096 = vmatpush.msra.mxu1 %v2905_v63 }
 0x15c   :  { %1037 = vmatpush.msrb.mxu2 %v2909_v0  ;;  %1057 = vmatpush.msrb.mxu3 %v2911_v3 }
 0x15d   :  { %1077 = vmatpush.msra.mxu0 %v2915_v5  ;;  %1097 = vmatpush.msra.mxu1 %v2917_v6 }
 0x15e   :  { %1038 = vmatpush.msrb.mxu2 %v2921_v1  ;;  %1058 = vmatpush.msrb.mxu3 %v2923_v2 }
 0x15f   :  { %1078 = vmatpush.msra.mxu0 %v2927_v4  ;;  %1098 = vmatpush.msra.mxu1 %v2929_v40 }
 0x160   :  { %1039 = vmatpush.msrb.mxu2 %v2933_v44  ;;  %1059 = vmatpush.msrb.mxu3 %v2935_v57 }
 0x161   :  { %1079 = vmatpush.msra.mxu0 %v2939_v60  ;;  %1099 = vmatpush.msra.mxu1 %v2941_v7 }
 0x162   :  { %1040 = vmatpush.msrb.mxu2 %v2945_v8  ;;  %1060 = vmatpush.msrb.mxu3 %v2947_v9 }
 0x163   :  { %1080 = vmatpush.msra.mxu0 %v2951_v10  ;;  %1100 = vmatpush.msra.mxu1 %v3577_v11 }
 0x164   :  { %1041 = vmatpush.msrb.mxu2 %v2957_v12  ;;  %1061 = vmatpush.msrb.mxu3 %v2959_v13 }
 0x165   :  { %1081 = vmatpush.msra.mxu0 %v2963_v14  ;;  %1101 = vmatpush.msra.mxu1 %v2965_v15 }
 0x166   :  { %1042 = vmatpush.msrb.mxu2 %v2969_v16  ;;  %1062 = vmatpush.msrb.mxu3 %v2971_v17 }
 0x167   :  { %1082 = vmatpush.msra.mxu0 %v2975_v18  ;;  %1102 = vmatpush.msra.mxu1 %v2977_v21 }
 0x168   :  { %1174 = vmatpush.msra.mxu2 %v2789_v19  ;;  %1194 = vmatpush.msra.mxu3 %v2791_v20 }
 0x169   :  { %1214 = vmatpush.msrb.mxu0 %v2795_v22  ;;  %1234 = vmatpush.msrb.mxu1 %v2797_v23 }
 0x16a   :  { %1175 = vmatpush.msra.mxu2 %v2805_v24  ;;  %1195 = vmatpush.msra.mxu3 %v2807_v25 }
 0x16b   :  { %1215 = vmatpush.msrb.mxu0 %v2809_v26  ;;  %1235 = vmatpush.msrb.mxu1 %v2811_v27 }
 0x16c   :  { %1176 = vmatpush.msra.mxu2 %v2813_v28  ;;  %1196 = vmatpush.msra.mxu3 %v2815_v29 }
 0x16d   :  { %1216 = vmatpush.msrb.mxu0 %v2819_v30  ;;  %1236 = vmatpush.msrb.mxu1 %v2821_v31 }
 0x16e   :  { %1177 = vmatpush.msra.mxu2 %v2825_v32  ;;  %1197 = vmatpush.msra.mxu3 %v2827_v33 }
 0x16f   :  { %1217 = vmatpush.msrb.mxu0 %v2831_v34  ;;  %1237 = vmatpush.msrb.mxu1 %v2833_v35 }
 0x170   :  { %1178 = vmatpush.msra.mxu2 %v2837_v36  ;;  %1198 = vmatpush.msra.mxu3 %v2839_v37 }
 0x171   :  { %1218 = vmatpush.msrb.mxu0 %v2843_v38  ;;  %1238 = vmatpush.msrb.mxu1 %v2845_v39 }
 0x172   :  { %1179 = vmatpush.msra.mxu2 %v2849_v41  ;;  %1199 = vmatpush.msra.mxu3 %v2851_v42 }
 0x173   :  { %1219 = vmatpush.msrb.mxu0 %v2855_v43  ;;  %1239 = vmatpush.msrb.mxu1 %v2857_v45 }
 0x174   :  { %1180 = vmatpush.msra.mxu2 %v2861_v46  ;;  %1200 = vmatpush.msra.mxu3 %v2863_v47 }
 0x175   :  { %1220 = vmatpush.msrb.mxu0 %v2867_v48  ;;  %1240 = vmatpush.msrb.mxu1 %v2869_v49 }
 0x176   :  { %1181 = vmatpush.msra.mxu2 %v2873_v50  ;;  %1201 = vmatpush.msra.mxu3 %v2875_v51 }
 0x177   :  { %1221 = vmatpush.msrb.mxu0 %v2879_v52  ;;  %1241 = vmatpush.msrb.mxu1 %v2881_v53 }
 0x178   :  { %1182 = vmatpush.msra.mxu2 %v2885_v54  ;;  %1202 = vmatpush.msra.mxu3 %v2887_v55 }
 0x179   :  { %1222 = vmatpush.msrb.mxu0 %v2891_v56  ;;  %1242 = vmatpush.msrb.mxu1 %v2893_v58 }
 0x17a   :  { %1183 = vmatpush.msra.mxu2 %v2897_v59  ;;  %1203 = vmatpush.msra.mxu3 %v2899_v61 }
 0x17b   :  { %1223 = vmatpush.msrb.mxu0 %v2903_v62  ;;  %1243 = vmatpush.msrb.mxu1 %v2905_v63 }
 0x17c   :  { %1184 = vmatpush.msra.mxu2 %v2909_v0  ;;  %1204 = vmatpush.msra.mxu3 %v2911_v3 }
 0x17d   :  { %1224 = vmatpush.msrb.mxu0 %v2915_v5  ;;  %1244 = vmatpush.msrb.mxu1 %v2917_v6 }
 0x17e   :  { %1185 = vmatpush.msra.mxu2 %v2921_v1  ;;  %1205 = vmatpush.msra.mxu3 %v2923_v2 }
 0x17f   :  { %1225 = vmatpush.msrb.mxu0 %v2927_v4  ;;  %1245 = vmatpush.msrb.mxu1 %v2929_v40 }
 0x180   :  { %1186 = vmatpush.msra.mxu2 %v2933_v44  ;;  %1206 = vmatpush.msra.mxu3 %v2935_v57 }
 0x181   :  { %1226 = vmatpush.msrb.mxu0 %v2939_v60  ;;  %1246 = vmatpush.msrb.mxu1 %v2941_v7 }
 0x182   :  { %1187 = vmatpush.msra.mxu2 %v2945_v8  ;;  %1207 = vmatpush.msra.mxu3 %v2947_v9  ;;  %v457_v9 = vpop.f32.mrf.mxu0  ;;  %v437_v8 = vpop.f32.mrf.mxu3 }
 0x183   :  { %1227 = vmatpush.msrb.mxu0 %v2951_v10  ;;  %1247 = vmatpush.msrb.mxu1 %v3577_v11  ;;  %v417_v10 = vpop.f32.mrf.mxu2 }
 0x184   :  { %1188 = vmatpush.msra.mxu2 %v2957_v12  ;;  %1208 = vmatpush.msra.mxu3 %v2959_v13 }
 0x185   :  { %1228 = vmatpush.msrb.mxu0 %v2963_v14  ;;  %1248 = vmatpush.msrb.mxu1 %v2965_v15 }
 0x186   :  { %1189 = vmatpush.msra.mxu2 %v2969_v16  ;;  %1209 = vmatpush.msra.mxu3 %v2971_v17  ;;  %v477_v17 = vpop.f32.mrf.mxu1 }
 0x187   :  { %1229 = vmatpush.msrb.mxu0 %v2975_v18  ;;  %1249 = vmatpush.msrb.mxu1 %v2977_v21 }
 0x18a   :  { %v3113_v11 = vpop.f32.mrf.mxu0  ;;  %v3117_v13 = vpop.f32.mrf.mxu3 }
 0x18b   :  { %3578 = vst [vmem:[#allocation40_spill] sm:$0xff] %v3113_v11  ;;  %v3115_v12 = vpop.f32.mrf.mxu2 }
 0x18c   :  { %3579 = vst [vmem:[#allocation41_spill] sm:$0xff] %v3115_v12 }
 0x18d   :  { %3580 = vst [vmem:[#allocation42_spill] sm:$0xff] %v3117_v13 }
 0x18e   :  { %v3131_v60 = vpop.f32.mrf.mxu1 }
 0x18f   :  { %3587 = vst [vmem:[#allocation49_spill] sm:$0xff] %v3131_v60 }
 0x192   :  { %v3119_v14 = vpop.f32.mrf.mxu0  ;;  %v3123_v16 = vpop.f32.mrf.mxu3 }
 0x193   :  { %3581 = vst [vmem:[#allocation43_spill] sm:$0xff] %v3119_v14  ;;  %v3121_v15 = vpop.f32.mrf.mxu2 }
 0x194   :  { %3582 = vst [vmem:[#allocation44_spill] sm:$0xff] %v3121_v15 }
 0x195   :  { %3583 = vst [vmem:[#allocation45_spill] sm:$0xff] %v3123_v16  ;;  %v390_v16 = vld [vmem:[%s3414_s5] sm:$0xf] }
 0x196   :  { %v3139_v14 = vpop.f32.mrf.mxu1 }
 0x197   :  { %3591 = vst [vmem:[#allocation53_spill] sm:$0xff] %v3139_v14 }
 0x19a   :  { %v3125_v7 = vpop.f32.mrf.mxu0  ;;  %v3129_v21 = vpop.f32.mrf.mxu3 }
 0x19b   :  { %3584 = vst [vmem:[#allocation46_spill] sm:$0xff] %v3125_v7  ;;  %v3127_v18 = vpop.f32.mrf.mxu2  ;;  %v3146_v7 = vperm.slane %v390_v16, 2 }
 0x19c   :  { %3585 = vst [vmem:[#allocation47_spill] sm:$0xff] %v3127_v18 }
 0x19d   :  { %3586 = vst [vmem:[#allocation48_spill] sm:$0xff] %v3129_v21 }
 0x19e   :  { %3593 = vst [vmem:[#allocation55_spill] sm:$0xff] %v3146_v7  ;;  %v3152_v60 = vpop.f32.mrf.mxu1 }
 0x19f   :  { %3596 = vst [vmem:[#allocation58_spill] sm:$0xff] %v3152_v60 }
 0x1a2   :  { %v3133_v11 = vpop.f32.mrf.mxu0  ;;  %v3137_v13 = vpop.f32.mrf.mxu3 }
 0x1a3   :  { %3588 = vst [vmem:[#allocation50_spill] sm:$0xff] %v3133_v11  ;;  %v3135_v12 = vpop.f32.mrf.mxu2  ;;  %v3155_v11 = vperm.slane %v390_v16, 0 }
 0x1a4   :  { %3589 = vst [vmem:[#allocation51_spill] sm:$0xff] %v3135_v12  ;;  %v458_v12 = vadd.f32 %v457_v9, %v3146_v7 }
 0x1a5   :  { %3590 = vst [vmem:[#allocation52_spill] sm:$0xff] %v3137_v13  ;;  %v3157_v13 = vperm.slane %v390_v16, 1  ;;  %v418_v40 = vadd.f32 %v417_v10, %v3155_v11 }
 0x1a6   :  { %3597 = vst [vmem:[#allocation59_spill] sm:$0xff] %v3155_v11  ;;  %v3161_v2 = vpop.f32.mrf.mxu1 }
 0x1a7   :  { %3598 = vst [vmem:[#allocation60_spill] sm:$0xff] %v3157_v13 }
 0x1a8   :  { %3599 = vst [vmem:[#allocation61_spill] sm:$0xff] %v3161_v2 }
 0x1aa   :  { %v3144_v15 = vpop.f32.mrf.mxu0  ;;  %v3150_v21 = vpop.f32.mrf.mxu3 }
 0x1ab   :  { %3592 = vst [vmem:[#allocation54_spill] sm:$0xff] %v3144_v15  ;;  %v3148_v18 = vpop.f32.mrf.mxu2  ;;  %v438_v15 = vadd.f32 %v437_v8, %v3157_v13 }
 0x1ac   :  { %3594 = vst [vmem:[#allocation56_spill] sm:$0xff] %v3148_v18 }
 0x1ad   :  { %3595 = vst [vmem:[#allocation57_spill] sm:$0xff] %v3150_v21 }
 0x1ae   :  { %v3163_v6 = vpop.f32.mrf.mxu1 }
 0x1af   :  { %3600 = vst [vmem:[#allocation62_spill] sm:$0xff] %v3163_v6 }
 0x1c4   :  { %v937_v14 = vpop.f32.mrf.mxu0  ;;  %v957_v2 = vpop.f32.mrf.mxu1 }
 0x1c5   :  { %v962_v57 = vadd.f32 %v937_v14, %v458_v12 }
 0x1c7   :  { %v1859_v44 = vmul.f32 -1.442695, %v962_v57 }
 0x1c9   :  { %1887 = vpow2.f32 %v1859_v44  ;;  %v897_v4 = vpop.f32.mrf.mxu2  ;;  %v917_v18 = vpop.f32.mrf.mxu3  ;;  %v3165_v44 = vperm.slane %v390_v16, 3 }
 0x1ca   :  { %v960_v21 = vadd.f32 %v897_v4, %v418_v40  ;;  %v961_v60 = vadd.f32 %v917_v18, %v438_v15 }
 0x1cb   :  { %3601 = vst [vmem:[#allocation63_spill] sm:$0xff] %v3165_v44  ;;  %v478_v4 = vadd.f32 %v477_v17, %v3165_v44 }
 0x1cc   :  { %v1857_v1 = vmul.f32 -1.442695, %v960_v21  ;;  %v1858_v9 = vmul.f32 -1.442695, %v961_v60 }
 0x1ce   :  { %1889 = vpow2.f32 %v1857_v1  ;;  %v963_v1 = vadd.f32 %v957_v2, %v478_v4 }
 0x1cf   :  { %v1888_v7 = vpop.eup %1887  ;;  %1891 = vpow2.f32 %v1858_v9 }
 0x1d0   :  { %v975_v12 = vadd.f32 1.0, %v1888_v7 }
 0x1d2   :  { %1893 = vrcp.f32 %v975_v12  ;;  %vm1011_vm10 = vweird.f32 %v975_v12 }
 0x1d4   :  { %v1890_v57 = vpop.eup %1889 }
 0x1d5   :  { %v1892_v14 = vpop.eup %1891  ;;  %v973_v10 = vadd.f32 1.0, %v1890_v57 }
 0x1d6   :  { %v974_v8 = vadd.f32 1.0, %v1892_v14 }
 0x1d7   :  { %1895 = vrcp.f32 %v973_v10  ;;  %v987_v6 = vand.u32 2147483648, %v973_v10  ;;  %v985_v16 = vand.u32 2147483647, %v973_v10  ;;  %vm981_vm3 = vweird.f32 %v973_v10 }
 0x1d8   :  { %1897 = vrcp.f32 %v974_v8  ;;  %v1894_v40 = vpop.eup %1893  ;;  %v1002_v14 = vand.u32 2147483648, %v974_v8  ;;  %v1000_v5 = vand.u32 2147483647, %v974_v8  ;;  %vm996_vm5 = vweird.f32 %v974_v8 }
 0x1d9   :  { %v1007_v9 = vmul.f32 %v1894_v40, %v975_v12  ;;  %1899 = vtanh.f32 %v963_v1  ;;  %v988_v2 = vor.u32 1.1754944e-38, %v987_v6  ;;  %vm986_vm6 = vcmp.eq.f32.partialorder %v985_v16, 8.507059e+37  ;;  %v3620_v16 = vld [vmem:[#allocation31_spill] sm:$0xff] }
 0x1da   :  { %v1003_v1 = vor.u32 1.1754944e-38, %v1002_v14  ;;  %vm1001_vm8 = vcmp.eq.f32.partialorder %v1000_v5, 8.507059e+37  ;;  %vm1012_vm9 = vweird.f32 %v1894_v40  ;;  %v1015_v6 = vand.u32 2147483647, %v975_v12  ;;  %v3621_v14 = vld [vmem:[#allocation32_spill] sm:$0xff] }
 0x1db   :  { %v1008_v3 = vsub.f32 1.0, %v1007_v9  ;;  %vm1013_vm11 = vmor %vm1011_vm10, %vm1012_vm9  ;;  %v3619_v9 = vld [vmem:[#allocation30_spill] sm:$0xff] }
 0x1dc   :  { %vm1016_vm12 = vcmp.eq.f32.partialorder %v1015_v6, 8.507059e+37 }
 0x1dd   :  { %v1896_v60 = vpop.eup %1895  ;;  %v1009_v63 = vmul.f32 %v1894_v40, %v1008_v3  ;;  %v3615_v3 = vld [vmem:[#allocation14_spill] sm:$0xff] }
 0x1de   :  { %v1898_v15 = vpop.eup %1897  ;;  %v977_v18 = vmul.f32 %v1896_v60, %v973_v10  ;;  %vm982_vm1 = vweird.f32 %v1896_v60  ;;  %v1017_v10 = vand.u32 2147483648, %v975_v12  ;;  %v3616_v12 = vld [vmem:[#allocation15_spill] sm:$0xff] }
 0x1df   :  { %v992_v21 = vmul.f32 %v1898_v15, %v974_v8  ;;  %vm997_vm2 = vweird.f32 %v1898_v15  ;;  %vm983_vm4 = vmor %vm981_vm3, %vm982_vm1 }
 0x1e0   :  { %v978_v7 = vsub.f32 1.0, %v977_v18  ;;  %vm998_vm7 = vmor %vm996_vm5, %vm997_vm2  ;;  %v1900_v18 = vpop.eup %1899  ;;  %v1018_v8 = vor.u32 1.1754944e-38, %v1017_v10 }
 0x1e1   :  { %v993_v57 = vsub.f32 1.0, %v992_v21 }
 0x1e2   :  { %v979_v13 = vmul.f32 %v1896_v60, %v978_v7 }
 0x1e3   :  { %v994_v11 = vmul.f32 %v1898_v15, %v993_v57 }
 0x1e4   :  { %v980_v17 = vadd.f32 %v1896_v60, %v979_v13  ;;  %v1010_v13 = vadd.f32 %v1894_v40, %v1009_v63  ;;  %v3613_v63 = vld [vmem:[#allocation13_spill] sm:$0xff] }
 0x1e5   :  { %v995_v4 = vadd.f32 %v1898_v15, %v994_v11 }
 0x1e6   :  { %v984_v44 = vsel %vm983_vm4, %v1896_v60, %v980_v17  ;;  %v1014_v11 = vsel %vm1013_vm11, %v1894_v40, %v1010_v13  ;;  %v3617_v40 = vld [vmem:[#allocation22_spill] sm:$0xff]  ;;  %v3622_v17 = vld [vmem:[#allocation33_spill] sm:$0xff]  ;;  %v3630_v13 = vld [vmem:[#allocation40_spill] sm:$0xff] }
 0x1e7   :  { %v989_v21 = vsel %vm986_vm6, %v988_v2, %v984_v44  ;;  %v999_v7 = vsel %vm998_vm7, %v1898_v15, %v995_v4  ;;  %v1019_v60 = vsel %vm1016_vm12, %v1018_v8, %v1014_v11  ;;  %v3618_v15 = vld [vmem:[#allocation29_spill] sm:$0xff]  ;;  %v3623_v2 = vld [vmem:[#allocation34_spill] sm:$0xff]  ;;  %v3624_v4 = vld [vmem:[#allocation35_spill] sm:$0xff] }
 0x1e8   :  { %v1004_v0 = vsel %vm1001_vm8, %v1003_v1, %v999_v7  ;;  %v1023_v57 = vmul.f32 %v1900_v18, %v989_v21  ;;  %v3625_v1 = vld [vmem:[#allocation36_spill] sm:$0xff]  ;;  %v3626_v18 = vld [vmem:[#allocation37_spill] sm:$0xff]  ;;  %v3627_v21 = vld [vmem:[#allocation38_spill] sm:$0xff] }
 0x1e9   :  { %v1022_v62 = vmul.f32 0.0, %v1004_v0  ;;  %v3614_v0 = vld [vmem:[#allocation16_spill] sm:$0xff]  ;;  %v3628_v7 = vld [vmem:[#allocation39_spill] sm:$0xff] }
 0x1eb   :  { %v3168_v61 = vadd.f32 %v1023_v57, %v1022_v62  ;;  %v3612_v62 = vld [vmem:[#allocation20_spill] sm:$0xff]  ;;  %v3629_v57 = vld [vmem:[#allocation55_spill] sm:$0xff] }
 0x1ec   :  { %v538_v10 = vadd.f32 %v3630_v13, %v3629_v57 }
 0x1ed   :  { %1901 = vtanh.f32 %v3168_v61 }
 0x1f3   :  { %v1902_v44 = vpop.eup %1901 }
 0x1f4   :  { %v1026_v5 = vmul.f32 %v1902_v44, %v1019_v60  ;;  %v3631_v44 = vld [vmem:[#allocation59_spill] sm:$0xff]  ;;  %v3632_v60 = vld [vmem:[#allocation41_spill] sm:$0xff] }
 0x1f6   :  { %1043 = vmatmul.f32.vlgmr.msrb.gmra.mxu2 %v1026_v5  ;;  %1063 = vmatmul.f32.vlgmr.msrb.gmra.mxu3 %v1026_v5 }
 0x1f7   :  { %1083 = vmatmul.f32.vlgmr.msra.gmra.mxu0 %v1026_v5  ;;  %1103 = vmatmul.f32.vlgmr.msra.gmra.mxu1 %v1026_v5  ;;  %v498_v5 = vadd.f32 %v3632_v60, %v3631_v44 }
 0x1f8   :  { %1321 = vmatpush.msrb.mxu2 %v2789_v19  ;;  %1341 = vmatpush.msrb.mxu3 %v2791_v20  ;;  %v3602_v19 = vld [vmem:[#allocation26_spill] sm:$0xff]  ;;  %v3603_v20 = vld [vmem:[#allocation27_spill] sm:$0xff] }
 0x1f9   :  { %1361 = vmatpush.msra.mxu0 %v2795_v22  ;;  %1381 = vmatpush.msra.mxu1 %v2797_v23  ;;  %v3604_v22 = vld [vmem:[#allocation24_spill] sm:$0xff]  ;;  %v3605_v23 = vld [vmem:[#allocation25_spill] sm:$0xff] }
 0x1fa   :  { %1322 = vmatpush.msrb.mxu2 %v2805_v24  ;;  %1342 = vmatpush.msrb.mxu3 %v2807_v25  ;;  %v3606_v24 = vld [vmem:[#allocation28_spill] sm:$0xff]  ;;  %v3607_v25 = vld [vmem:[#allocation17_spill] sm:$0xff] }
 0x1fb   :  { %1362 = vmatpush.msra.mxu0 %v2809_v26  ;;  %1382 = vmatpush.msra.mxu1 %v2811_v27  ;;  %v3608_v26 = vld [vmem:[#allocation18_spill] sm:$0xff]  ;;  %v3609_v27 = vld [vmem:[#allocation23_spill] sm:$0xff] }
 0x1fc   :  { %1323 = vmatpush.msrb.mxu2 %v2813_v28  ;;  %1343 = vmatpush.msrb.mxu3 %v2815_v29  ;;  %v3610_v28 = vld [vmem:[#allocation21_spill] sm:$0xff]  ;;  %v3611_v29 = vld [vmem:[#allocation19_spill] sm:$0xff] }
 0x1fd   :  { %1363 = vmatpush.msra.mxu0 %v2819_v30  ;;  %1383 = vmatpush.msra.mxu1 %v2821_v31 }
 0x1fe   :  { %1324 = vmatpush.msrb.mxu2 %v2825_v32  ;;  %1344 = vmatpush.msrb.mxu3 %v2827_v33 }
 0x1ff   :  { %1364 = vmatpush.msra.mxu0 %v2831_v34  ;;  %1384 = vmatpush.msra.mxu1 %v2833_v35 }
 0x200   :  { %1325 = vmatpush.msrb.mxu2 %v2837_v36  ;;  %1345 = vmatpush.msrb.mxu3 %v2839_v37 }
 0x201   :  { %1365 = vmatpush.msra.mxu0 %v2843_v38  ;;  %1385 = vmatpush.msra.mxu1 %v2845_v39 }
 0x202   :  { %1326 = vmatpush.msrb.mxu2 %v2849_v41  ;;  %1346 = vmatpush.msrb.mxu3 %v2851_v42 }
 0x203   :  { %1366 = vmatpush.msra.mxu0 %v2855_v43  ;;  %1386 = vmatpush.msra.mxu1 %v2857_v45 }
 0x204   :  { %1327 = vmatpush.msrb.mxu2 %v2861_v46  ;;  %1347 = vmatpush.msrb.mxu3 %v2863_v47 }
 0x205   :  { %1367 = vmatpush.msra.mxu0 %v2867_v48  ;;  %1387 = vmatpush.msra.mxu1 %v2869_v49 }
 0x206   :  { %1328 = vmatpush.msrb.mxu2 %v2873_v50  ;;  %1348 = vmatpush.msrb.mxu3 %v2875_v51 }
 0x207   :  { %1368 = vmatpush.msra.mxu0 %v2879_v52  ;;  %1388 = vmatpush.msra.mxu1 %v2881_v53 }
 0x208   :  { %1329 = vmatpush.msrb.mxu2 %v2885_v54  ;;  %1349 = vmatpush.msrb.mxu3 %v2887_v55 }
 0x209   :  { %1369 = vmatpush.msra.mxu0 %v2891_v56  ;;  %1389 = vmatpush.msra.mxu1 %v2893_v58 }
 0x20a   :  { %1330 = vmatpush.msrb.mxu2 %v2897_v59  ;;  %1350 = vmatpush.msrb.mxu3 %v3602_v19 }
 0x20b   :  { %1370 = vmatpush.msra.mxu0 %v3603_v20  ;;  %1390 = vmatpush.msra.mxu1 %v3604_v22 }
 0x20c   :  { %1331 = vmatpush.msrb.mxu2 %v3605_v23  ;;  %1351 = vmatpush.msrb.mxu3 %v3606_v24 }
 0x20d   :  { %1371 = vmatpush.msra.mxu0 %v3607_v25  ;;  %1391 = vmatpush.msra.mxu1 %v3608_v26 }
 0x20e   :  { %1332 = vmatpush.msrb.mxu2 %v3609_v27  ;;  %1352 = vmatpush.msrb.mxu3 %v3610_v28 }
 0x20f   :  { %1372 = vmatpush.msra.mxu0 %v3611_v29  ;;  %1392 = vmatpush.msra.mxu1 %v3612_v62 }
 0x210   :  { %1333 = vmatpush.msrb.mxu2 %v3613_v63  ;;  %1353 = vmatpush.msrb.mxu3 %v3614_v0 }
 0x211   :  { %1373 = vmatpush.msra.mxu0 %v3615_v3  ;;  %1393 = vmatpush.msra.mxu1 %v3616_v12 }
 0x212   :  { %1334 = vmatpush.msrb.mxu2 %v3617_v40  ;;  %1354 = vmatpush.msrb.mxu3 %v3618_v15 }
 0x213   :  { %1374 = vmatpush.msra.mxu0 %v3619_v9  ;;  %1394 = vmatpush.msra.mxu1 %v3620_v16 }
 0x214   :  { %1335 = vmatpush.msrb.mxu2 %v3621_v14  ;;  %1355 = vmatpush.msrb.mxu3 %v3622_v17  ;;  %v3634_v17 = vld [vmem:[#allocation42_spill] sm:$0xff] }
 0x215   :  { %1375 = vmatpush.msra.mxu0 %v3623_v2  ;;  %1395 = vmatpush.msra.mxu1 %v3624_v4  ;;  %v3633_v2 = vld [vmem:[#allocation60_spill] sm:$0xff] }
 0x216   :  { %1336 = vmatpush.msrb.mxu2 %v3625_v1  ;;  %1356 = vmatpush.msrb.mxu3 %v3626_v18  ;;  %v518_v4 = vadd.f32 %v3634_v17, %v3633_v2  ;;  %v3635_v17 = vld [vmem:[#allocation63_spill] sm:$0xff] }
 0x217   :  { %1376 = vmatpush.msra.mxu0 %v3627_v21  ;;  %1396 = vmatpush.msra.mxu1 %v3628_v7 }
 0x274   :  { %v1084_v6 = vpop.f32.mrf.mxu0  ;;  %v1104_v60 = vpop.f32.mrf.mxu1 }
 0x275   :  { %v1109_v11 = vadd.f32 %v1084_v6, %v538_v10 }
 0x277   :  { %v1862_v8 = vmul.f32 -1.442695, %v1109_v11 }
 0x279   :  { %1903 = vpow2.f32 %v1862_v8  ;;  %v1044_v1 = vpop.f32.mrf.mxu2  ;;  %v1064_v14 = vpop.f32.mrf.mxu3  ;;  %v3636_v8 = vld [vmem:[#allocation49_spill] sm:$0xff] }
 0x27a   :  { %v1107_v18 = vadd.f32 %v1044_v1, %v498_v5  ;;  %v1108_v16 = vadd.f32 %v1064_v14, %v518_v4  ;;  %v558_v2 = vadd.f32 %v3636_v8, %v3635_v17 }
 0x27c   :  { %v1860_v21 = vmul.f32 -1.442695, %v1107_v18  ;;  %v1861_v9 = vmul.f32 -1.442695, %v1108_v16  ;;  %v1110_v14 = vadd.f32 %v1104_v60, %v558_v2 }
 0x27e   :  { %1905 = vpow2.f32 %v1860_v21 }
 0x27f   :  { %v1904_v7 = vpop.eup %1903  ;;  %1907 = vpow2.f32 %v1861_v9 }
 0x280   :  { %v1122_v13 = vadd.f32 1.0, %v1904_v7 }
 0x282   :  { %1909 = vrcp.f32 %v1122_v13  ;;  %vm1158_vm6 = vweird.f32 %v1122_v13 }
 0x284   :  { %v1906_v57 = vpop.eup %1905 }
 0x285   :  { %v1908_v10 = vpop.eup %1907  ;;  %v1120_v6 = vadd.f32 1.0, %v1906_v57 }
 0x286   :  { %v1121_v11 = vadd.f32 1.0, %v1908_v10 }
 0x287   :  { %1911 = vrcp.f32 %v1120_v6  ;;  %v1134_v7 = vand.u32 2147483648, %v1120_v6  ;;  %v1132_v10 = vand.u32 2147483647, %v1120_v6  ;;  %vm1128_vm15 = vweird.f32 %v1120_v6 }
 0x288   :  { %1913 = vrcp.f32 %v1121_v11  ;;  %v1910_v44 = vpop.eup %1909  ;;  %v1149_v15 = vand.u32 2147483648, %v1121_v11  ;;  %v1147_v12 = vand.u32 2147483647, %v1121_v11  ;;  %vm1143_vm1 = vweird.f32 %v1121_v11 }
 0x289   :  { %v1154_v21 = vmul.f32 %v1910_v44, %v1122_v13  ;;  %1915 = vtanh.f32 %v1110_v14  ;;  %v1135_v2 = vor.u32 1.1754944e-38, %v1134_v7  ;;  %vm1133_vm2 = vcmp.eq.f32.partialorder %v1132_v10, 8.507059e+37  ;;  %v3274_v10 = vld [vmem:[#allocation6 + $0x1a8] sm:$0xff] }
 0x28a   :  { %v1150_v14 = vor.u32 1.1754944e-38, %v1149_v15  ;;  %vm1148_vm4 = vcmp.eq.f32.partialorder %v1147_v12, 8.507059e+37  ;;  %vm1159_vm5 = vweird.f32 %v1910_v44  ;;  %v1164_v7 = vand.u32 2147483648, %v1122_v13 }
 0x28b   :  { %v1155_v3 = vsub.f32 1.0, %v1154_v21  ;;  %vm1160_vm7 = vmor %vm1158_vm6, %vm1159_vm5 }
 0x28d   :  { %v1912_v1 = vpop.eup %1911  ;;  %v1156_v63 = vmul.f32 %v1910_v44, %v1155_v3  ;;  %v3259_v3 = vld [vmem:[#allocation6 + $0x1c0] sm:$0xff] }
 0x28e   :  { %v1914_v4 = vpop.eup %1913  ;;  %v1124_v16 = vmul.f32 %v1912_v1, %v1120_v6  ;;  %vm1129_vm13 = vweird.f32 %v1912_v1 }
 0x28f   :  { %v1139_v18 = vmul.f32 %v1914_v4, %v1121_v11  ;;  %vm1144_vm14 = vweird.f32 %v1914_v4  ;;  %vm1130_vm0 = vmor %vm1128_vm15, %vm1129_vm13  ;;  %v1157_v6 = vadd.f32 %v1910_v44, %v1156_v63  ;;  %v1165_v11 = vor.u32 1.1754944e-38, %v1164_v7  ;;  %v3253_v63 = vld [vmem:[#allocation6 + $0x1f0] sm:$0xff] }
 0x290   :  { %v1125_v9 = vsub.f32 1.0, %v1124_v16  ;;  %vm1145_vm3 = vmor %vm1143_vm1, %vm1144_vm14  ;;  %v1916_v16 = vpop.eup %1915 }
 0x291   :  { %v1140_v5 = vsub.f32 1.0, %v1139_v18  ;;  %v1161_v15 = vsel %vm1160_vm7, %v1910_v44, %v1157_v6  ;;  %v3262_v44 = vld [vmem:[#allocation6 + $0x1c8] sm:$0xff] }
 0x292   :  { %v1126_v57 = vmul.f32 %v1912_v1, %v1125_v9 }
 0x293   :  { %v1141_v40 = vmul.f32 %v1914_v4, %v1140_v5 }
 0x294   :  { %v1127_v8 = vadd.f32 %v1912_v1, %v1126_v57  ;;  %v3271_v57 = vld [vmem:[#allocation6 + $0x1a0] sm:$0xff] }
 0x295   :  { %v1142_v60 = vadd.f32 %v1914_v4, %v1141_v40  ;;  %v1162_v40 = vand.u32 2147483647, %v1122_v13  ;;  %v3265_v13 = vld [vmem:[#allocation6 + $0x1d0] sm:$0xff] }
 0x296   :  { %v1131_v17 = vsel %vm1130_vm0, %v1912_v1, %v1127_v8 }
 0x297   :  { %v1136_v18 = vsel %vm1133_vm2, %v1135_v2, %v1131_v17  ;;  %v1146_v9 = vsel %vm1145_vm3, %v1914_v4, %v1142_v60  ;;  %vm1163_vm8 = vcmp.eq.f32.partialorder %v1162_v40, 8.507059e+37  ;;  %v3268_v4 = vld [vmem:[#allocation6 + $0x1d8] sm:$0xff] }
 0x298   :  { %v1151_v0 = vsel %vm1148_vm4, %v1150_v14, %v1146_v9  ;;  %v1170_v5 = vmul.f32 %v1916_v16, %v1136_v18  ;;  %v1166_v12 = vsel %vm1163_vm8, %v1165_v11, %v1161_v15  ;;  %v3660_v18 = vld [vmem:[#allocation63_spill] sm:$0xff]  ;;  %v3661_v9 = vld [vmem:[#allocation53_spill] sm:$0xff] }
 0x299   :  { %v1169_v62 = vmul.f32 %v1151_v0, %v3168_v61  ;;  %v3247_v61 = vld [vmem:[#allocation6 + $0x1e0] sm:$0xff]  ;;  %v3256_v0 = vld [vmem:[#allocation6 + $0x1f8] sm:$0xff] }
 0x29b   :  { %v3244_v21 = vadd.f32 %v1170_v5, %v1169_v62  ;;  %v3250_v62 = vld [vmem:[#allocation6 + $0x1e8] sm:$0xff]  ;;  %v638_v5 = vadd.f32 %v3661_v9, %v3660_v18  ;;  %v2014_v9 = vld [vmem:[#allocation6 + $0x118] sm:$0xff] }
 0x29d   :  { %1917 = vtanh.f32 %v3244_v21 }
 0x2a3   :  { %v1918_v17 = vpop.eup %1917 }
 0x2a4   :  { %v1173_v1 = vmul.f32 %v1918_v17, %v1166_v12 }
 0x2a6   :  { %1190 = vmatmul.f32.vlgmr.msra.gmra.mxu2 %v1173_v1  ;;  %1210 = vmatmul.f32.vlgmr.msra.gmra.mxu3 %v1173_v1 }
 0x2a7   :  { %1230 = vmatmul.f32.vlgmr.msrb.gmra.mxu0 %v1173_v1  ;;  %1250 = vmatmul.f32.vlgmr.msrb.gmra.mxu1 %v1173_v1 }
 0x2a8   :  { %1468 = vmatpush.msra.mxu2 %v3247_v61  ;;  %1488 = vmatpush.msra.mxu3 %v3250_v62 }
 0x2a9   :  { %1508 = vmatpush.msrb.mxu0 %v3253_v63  ;;  %1528 = vmatpush.msrb.mxu1 %v3256_v0 }
 0x2aa   :  { %1469 = vmatpush.msra.mxu2 %v3259_v3  ;;  %1489 = vmatpush.msra.mxu3 %v3262_v44 }
 0x2ab   :  { %1509 = vmatpush.msrb.mxu0 %v3265_v13  ;;  %1529 = vmatpush.msrb.mxu1 %v3268_v4 }
 0x2ac   :  { %1470 = vmatpush.msra.mxu2 %v3271_v57  ;;  %1490 = vmatpush.msra.mxu3 %v3274_v10 }
 0x2ad   :  { %1510 = vmatpush.msrb.mxu0 %v2819_v30  ;;  %1530 = vmatpush.msrb.mxu1 %v2821_v31  ;;  %v3637_v30 = vld [vmem:[#allocation20_spill] sm:$0xff]  ;;  %v3638_v31 = vld [vmem:[#allocation13_spill] sm:$0xff] }
 0x2ae   :  { %1471 = vmatpush.msra.mxu2 %v2825_v32  ;;  %1491 = vmatpush.msra.mxu3 %v2827_v33  ;;  %v3639_v32 = vld [vmem:[#allocation16_spill] sm:$0xff]  ;;  %v3640_v33 = vld [vmem:[#allocation14_spill] sm:$0xff] }
 0x2af   :  { %1511 = vmatpush.msrb.mxu0 %v2831_v34  ;;  %1531 = vmatpush.msrb.mxu1 %v2833_v35  ;;  %v3641_v34 = vld [vmem:[#allocation15_spill] sm:$0xff]  ;;  %v3642_v35 = vld [vmem:[#allocation22_spill] sm:$0xff] }
 0x2b0   :  { %1472 = vmatpush.msra.mxu2 %v2837_v36  ;;  %1492 = vmatpush.msra.mxu3 %v2839_v37  ;;  %v3643_v36 = vld [vmem:[#allocation29_spill] sm:$0xff]  ;;  %v3644_v37 = vld [vmem:[#allocation30_spill] sm:$0xff] }
 0x2b1   :  { %1512 = vmatpush.msrb.mxu0 %v2843_v38  ;;  %1532 = vmatpush.msrb.mxu1 %v2845_v39  ;;  %v3645_v38 = vld [vmem:[#allocation31_spill] sm:$0xff]  ;;  %v3646_v39 = vld [vmem:[#allocation32_spill] sm:$0xff] }
 0x2b2   :  { %1473 = vmatpush.msra.mxu2 %v2849_v41  ;;  %1493 = vmatpush.msra.mxu3 %v2851_v42  ;;  %v3647_v41 = vld [vmem:[#allocation33_spill] sm:$0xff]  ;;  %v3648_v42 = vld [vmem:[#allocation34_spill] sm:$0xff] }
 0x2b3   :  { %1513 = vmatpush.msrb.mxu0 %v2855_v43  ;;  %1533 = vmatpush.msrb.mxu1 %v2857_v45  ;;  %v3649_v43 = vld [vmem:[#allocation35_spill] sm:$0xff]  ;;  %v3650_v45 = vld [vmem:[#allocation36_spill] sm:$0xff] }
 0x2b4   :  { %1474 = vmatpush.msra.mxu2 %v2861_v46  ;;  %1494 = vmatpush.msra.mxu3 %v2863_v47  ;;  %v3651_v46 = vld [vmem:[#allocation37_spill] sm:$0xff]  ;;  %v3652_v47 = vld [vmem:[#allocation38_spill] sm:$0xff] }
 0x2b5   :  { %1514 = vmatpush.msrb.mxu0 %v2867_v48  ;;  %1534 = vmatpush.msrb.mxu1 %v2869_v49  ;;  %v3653_v48 = vld [vmem:[#allocation39_spill] sm:$0xff] }
 0x2b6   :  { %1475 = vmatpush.msra.mxu2 %v2873_v50  ;;  %1495 = vmatpush.msra.mxu3 %v2875_v51  ;;  %v3654_v49 = vld [vmem:[#allocation55_spill] sm:$0xff] }
 0x2b7   :  { %1515 = vmatpush.msrb.mxu0 %v2879_v52  ;;  %1535 = vmatpush.msrb.mxu1 %v2881_v53  ;;  %v3655_v50 = vld [vmem:[#allocation43_spill] sm:$0xff] }
 0x2b8   :  { %1476 = vmatpush.msra.mxu2 %v2885_v54  ;;  %1496 = vmatpush.msra.mxu3 %v2887_v55  ;;  %v618_v51 = vadd.f32 %v3655_v50, %v3654_v49  ;;  %v3656_v55 = vld [vmem:[#allocation59_spill] sm:$0xff] }
 0x2b9   :  { %1516 = vmatpush.msrb.mxu0 %v2891_v56  ;;  %1536 = vmatpush.msrb.mxu1 %v2893_v58  ;;  %v3657_v56 = vld [vmem:[#allocation44_spill] sm:$0xff] }
 0x2ba   :  { %1477 = vmatpush.msra.mxu2 %v2897_v59  ;;  %1497 = vmatpush.msra.mxu3 %v3602_v19  ;;  %v578_v58 = vadd.f32 %v3657_v56, %v3656_v55  ;;  %v3658_v59 = vld [vmem:[#allocation60_spill] sm:$0xff]  ;;  %v3659_v19 = vld [vmem:[#allocation45_spill] sm:$0xff] }
 0x2bb   :  { %1517 = vmatpush.msrb.mxu0 %v3603_v20  ;;  %1537 = vmatpush.msrb.mxu1 %v3604_v22  ;;  %v598_v20 = vadd.f32 %v3659_v19, %v3658_v59 }
 0x2bc   :  { %1478 = vmatpush.msra.mxu2 %v3605_v23  ;;  %1498 = vmatpush.msra.mxu3 %v3606_v24 }
 0x2bd   :  { %1518 = vmatpush.msrb.mxu0 %v3607_v25  ;;  %1538 = vmatpush.msrb.mxu1 %v3608_v26 }
 0x2be   :  { %1479 = vmatpush.msra.mxu2 %v3609_v27  ;;  %1499 = vmatpush.msra.mxu3 %v3610_v28 }
 0x2bf   :  { %1519 = vmatpush.msrb.mxu0 %v3611_v29  ;;  %1539 = vmatpush.msrb.mxu1 %v3637_v30 }
 0x2c0   :  { %1480 = vmatpush.msra.mxu2 %v3638_v31  ;;  %1500 = vmatpush.msra.mxu3 %v3639_v32 }
 0x2c1   :  { %1520 = vmatpush.msrb.mxu0 %v3640_v33  ;;  %1540 = vmatpush.msrb.mxu1 %v3641_v34 }
 0x2c2   :  { %1481 = vmatpush.msra.mxu2 %v3642_v35  ;;  %1501 = vmatpush.msra.mxu3 %v3643_v36 }
 0x2c3   :  { %1521 = vmatpush.msrb.mxu0 %v3644_v37  ;;  %1541 = vmatpush.msrb.mxu1 %v3645_v38 }
 0x2c4   :  { %1482 = vmatpush.msra.mxu2 %v3646_v39  ;;  %1502 = vmatpush.msra.mxu3 %v3647_v41 }
 0x2c5   :  { %1522 = vmatpush.msrb.mxu0 %v3648_v42  ;;  %1542 = vmatpush.msrb.mxu1 %v3649_v43 }
 0x2c6   :  { %1483 = vmatpush.msra.mxu2 %v3650_v45  ;;  %1503 = vmatpush.msra.mxu3 %v3651_v46 }
 0x2c7   :  { %1523 = vmatpush.msrb.mxu0 %v3652_v47  ;;  %1543 = vmatpush.msrb.mxu1 %v3653_v48 }
 0x324   :  { %v1231_v52 = vpop.f32.mrf.mxu0  ;;  %v1251_v16 = vpop.f32.mrf.mxu1 }
 0x325   :  { %v1256_v53 = vadd.f32 %v1231_v52, %v618_v51  ;;  %v1257_v40 = vadd.f32 %v1251_v16, %v638_v5  ;;  %v2013_v16 = vld [vmem:[#allocation6 + $0x110] sm:$0xff]  ;;  %v2015_v5 = vld [vmem:[#allocation6 + $0xe0] sm:$0xff] }
 0x327   :  { %v1865_v54 = vmul.f32 -1.442695, %v1256_v53 }
 0x329   :  { %1919 = vpow2.f32 %v1865_v54  ;;  %v1191_v22 = vpop.f32.mrf.mxu2  ;;  %v1211_v23 = vpop.f32.mrf.mxu3 }
 0x32a   :  { %v1254_v24 = vadd.f32 %v1191_v22, %v578_v58  ;;  %v1255_v25 = vadd.f32 %v1211_v23, %v598_v20 }
 0x32c   :  { %v1863_v26 = vmul.f32 -1.442695, %v1254_v24  ;;  %v1864_v27 = vmul.f32 -1.442695, %v1255_v25  ;;  %v2004_v25 = vld [vmem:[#allocation6 + $0x148] sm:$0xff] }
 0x32e   :  { %1921 = vpow2.f32 %v1863_v26  ;;  %v2005_v26 = vld [vmem:[#allocation6 + $0x150] sm:$0xff] }
 0x32f   :  { %v1920_v28 = vpop.eup %1919  ;;  %1923 = vpow2.f32 %v1864_v27  ;;  %v2006_v27 = vld [vmem:[#allocation6 + $0x158] sm:$0xff] }
 0x330   :  { %v1269_v29 = vadd.f32 1.0, %v1920_v28  ;;  %v2007_v28 = vld [vmem:[#allocation6 + $0x120] sm:$0xff] }
 0x332   :  { %1925 = vrcp.f32 %v1269_v29  ;;  %v1311_v56 = vand.u32 2147483648, %v1269_v29  ;;  %vm1305_vm2 = vweird.f32 %v1269_v29  ;;  %v1309_v58 = vand.u32 2147483647, %v1269_v29 }
 0x334   :  { %v1922_v8 = vpop.eup %1921  ;;  %v1312_v20 = vor.u32 1.1754944e-38, %v1311_v56  ;;  %vm1310_vm4 = vcmp.eq.f32.partialorder %v1309_v58, 8.507059e+37  ;;  %v2045_v56 = vld [vmem:[#allocation6 + $0x10] sm:$0xff]  ;;  %v2046_v58 = vld [vmem:[#allocation6 + $0x18] sm:$0xff] }
 0x335   :  { %v1924_v2 = vpop.eup %1923  ;;  %v1267_v60 = vadd.f32 1.0, %v1922_v8  ;;  %v2009_v8 = vld [vmem:[#allocation6 + $0x130] sm:$0xff] }
 0x336   :  { %v1268_v14 = vadd.f32 1.0, %v1924_v2  ;;  %v2010_v2 = vld [vmem:[#allocation6 + $0x138] sm:$0xff] }
 0x337   :  { %1927 = vrcp.f32 %v1267_v60  ;;  %v1281_v30 = vand.u32 2147483648, %v1267_v60  ;;  %v1279_v33 = vand.u32 2147483647, %v1267_v60  ;;  %vm1275_vm11 = vweird.f32 %v1267_v60 }
 0x338   :  { %1929 = vrcp.f32 %v1268_v14  ;;  %v1926_v6 = vpop.eup %1925  ;;  %v1296_v34 = vand.u32 2147483648, %v1268_v14  ;;  %v1294_v36 = vand.u32 2147483647, %v1268_v14  ;;  %vm1290_vm13 = vweird.f32 %v1268_v14 }
 0x339   :  { %v1301_v12 = vmul.f32 %v1926_v6, %v1269_v29  ;;  %1931 = vtanh.f32 %v1257_v40  ;;  %v1282_v39 = vor.u32 1.1754944e-38, %v1281_v30  ;;  %vm1280_vm14 = vcmp.eq.f32.partialorder %v1279_v33, 8.507059e+37  ;;  %v2008_v29 = vld [vmem:[#allocation6 + $0x128] sm:$0xff]  ;;  %v2018_v40 = vld [vmem:[#allocation6 + $0xf8] sm:$0xff]  ;;  %v2027_v33 = vld [vmem:[#allocation6 + $0x80] sm:$0xff] }
 0x33a   :  { %v1297_v43 = vor.u32 1.1754944e-38, %v1296_v34  ;;  %vm1295_vm0 = vcmp.eq.f32.partialorder %v1294_v36, 8.507059e+37  ;;  %vm1306_vm1 = vweird.f32 %v1926_v6  ;;  %v2024_v30 = vld [vmem:[#allocation6 + $0xa8] sm:$0xff]  ;;  %v2030_v36 = vld [vmem:[#allocation6 + $0x98] sm:$0xff] }
 0x33b   :  { %v1302_v37 = vsub.f32 1.0, %v1301_v12  ;;  %vm1307_vm3 = vmor %vm1305_vm2, %vm1306_vm1  ;;  %v2022_v12 = vld [vmem:[#allocation6 + $0xd8] sm:$0xff]  ;;  %v2028_v34 = vld [vmem:[#allocation6 + $0x88] sm:$0xff] }
 0x33d   :  { %v1928_v7 = vpop.eup %1927  ;;  %v1303_v50 = vmul.f32 %v1926_v6, %v1302_v37  ;;  %v2031_v37 = vld [vmem:[#allocation6 + $0x60] sm:$0xff] }
 0x33e   :  { %v1930_v15 = vpop.eup %1929  ;;  %v1271_v11 = vmul.f32 %v1928_v7, %v1267_v60  ;;  %vm1276_vm9 = vweird.f32 %v1928_v7  ;;  %v2011_v60 = vld [vmem:[#allocation6 + $0x100] sm:$0xff] }
 0x33f   :  { %v1286_v17 = vmul.f32 %v1930_v15, %v1268_v14  ;;  %vm1291_vm10 = vweird.f32 %v1930_v15  ;;  %vm1277_vm12 = vmor %vm1275_vm11, %vm1276_vm9  ;;  %v1932_v45 = vpop.eup %1931  ;;  %v1304_v54 = vadd.f32 %v1926_v6, %v1303_v50  ;;  %v2012_v14 = vld [vmem:[#allocation6 + $0x108] sm:$0xff]  ;;  %v2041_v50 = vld [vmem:[#allocation6 + $0x30] sm:$0xff] }
 0x340   :  { %v1272_v1 = vsub.f32 1.0, %v1271_v11  ;;  %vm1292_vm15 = vmor %vm1290_vm13, %vm1291_vm10  ;;  %v2020_v11 = vld [vmem:[#allocation6 + $0xc8] sm:$0xff] }
 0x341   :  { %v1287_v31 = vsub.f32 1.0, %v1286_v17  ;;  %v1308_v19 = vsel %vm1307_vm3, %v1926_v6, %v1304_v54  ;;  %v2016_v6 = vld [vmem:[#allocation6 + $0xe8] sm:$0xff]  ;;  %v2021_v17 = vld [vmem:[#allocation6 + $0xd0] sm:$0xff] }
 0x342   :  { %v1273_v32 = vmul.f32 %v1928_v7, %v1272_v1  ;;  %v1313_v23 = vsel %vm1310_vm4, %v1312_v20, %v1308_v19  ;;  %v2023_v1 = vld [vmem:[#allocation6 + $0xa0] sm:$0xff]  ;;  %v2044_v54 = vld [vmem:[#allocation6 + $0x8] sm:$0xff] }
 0x343   :  { %v1288_v35 = vmul.f32 %v1930_v15, %v1287_v31  ;;  %v2025_v31 = vld [vmem:[#allocation6 + $0xb0] sm:$0xff]  ;;  %v3662_v19 = vld [vmem:[#allocation46_spill] sm:$0xff] }
 0x344   :  { %v1274_v38 = vadd.f32 %v1928_v7, %v1273_v32  ;;  %v2026_v32 = vld [vmem:[#allocation6 + $0xb8] sm:$0xff]  ;;  %v698_v20 = vadd.f32 %v3662_v19, %v3654_v49 }
 0x345   :  { %v1289_v41 = vadd.f32 %v1930_v15, %v1288_v35  ;;  %v2029_v35 = vld [vmem:[#allocation6 + $0x90] sm:$0xff] }
 0x346   :  { %v1278_v42 = vsel %vm1277_vm12, %v1928_v7, %v1274_v38  ;;  %v2017_v7 = vld [vmem:[#allocation6 + $0xf0] sm:$0xff]  ;;  %v2032_v38 = vld [vmem:[#allocation6 + $0x68] sm:$0xff] }
 0x347   :  { %v1283_v46 = vsel %vm1280_vm14, %v1282_v39, %v1278_v42  ;;  %v1293_v47 = vsel %vm1292_vm15, %v1930_v15, %v1289_v41  ;;  %v2019_v15 = vld [vmem:[#allocation6 + $0xc0] sm:$0xff]  ;;  %v2033_v39 = vld [vmem:[#allocation6 + $0x70] sm:$0xff]  ;;  %v2034_v41 = vld [vmem:[#allocation6 + $0x78] sm:$0xff] }
 0x348   :  { %v1298_v48 = vsel %vm1295_vm0, %v1297_v43, %v1293_v47  ;;  %v1317_v51 = vmul.f32 %v1932_v45, %v1283_v46  ;;  %v2035_v42 = vld [vmem:[#allocation6 + $0x40] sm:$0xff]  ;;  %v2036_v43 = vld [vmem:[#allocation6 + $0x48] sm:$0xff]  ;;  %v2037_v45 = vld [vmem:[#allocation6 + $0x50] sm:$0xff] }
 0x349   :  { %v1316_v52 = vmul.f32 %v1298_v48, %v3244_v21  ;;  %v1993_v21 = vld [vmem:[#allocation6 + $0x1b0] sm:$0xff]  ;;  %v2038_v46 = vld [vmem:[#allocation6 + $0x58] sm:$0xff]  ;;  %v2039_v47 = vld [vmem:[#allocation6 + $0x20] sm:$0xff] }
 0x34a   :  { %v2040_v48 = vld [vmem:[#allocation6 + $0x28] sm:$0xff] }
 0x34b   :  { %v3340_v53 = vadd.f32 %v1317_v51, %v1316_v52  ;;  %v2042_v51 = vld [vmem:[#allocation6 + $0x38] sm:$0xff]  ;;  %v2043_v52 = vld [vmem:[#allocation6] sm:$0xff] }
 0x34d   :  { %1933 = vtanh.f32 %v3340_v53 }
 0x353   :  { %v1934_v22 = vpop.eup %1933 }
 0x354   :  { %v1320_v24 = vmul.f32 %v1934_v22, %v1313_v23 }
 0x356   :  { %1337 = vmatmul.f32.vlgmr.msrb.gmra.mxu2 %v1320_v24  ;;  %1357 = vmatmul.f32.vlgmr.msrb.gmra.mxu3 %v1320_v24 }
 0x357   :  { %1377 = vmatmul.f32.vlgmr.msra.gmra.mxu0 %v1320_v24  ;;  %1397 = vmatmul.f32.vlgmr.msra.gmra.mxu1 %v1320_v24 }
 0x358   :  { %1615 = vmatpush.msrb.mxu2 %v3247_v61  ;;  %1635 = vmatpush.msrb.mxu3 %v3250_v62  ;;  %v1994_v61 = vld [vmem:[#allocation6 + $0x1b8] sm:$0xff]  ;;  %v1995_v62 = vld [vmem:[#allocation6 + $0x180] sm:$0xff] }
 0x359   :  { %1655 = vmatpush.msra.mxu0 %v3253_v63  ;;  %1675 = vmatpush.msra.mxu1 %v3256_v0  ;;  %v1996_v63 = vld [vmem:[#allocation6 + $0x188] sm:$0xff]  ;;  %v1997_v0 = vld [vmem:[#allocation6 + $0x190] sm:$0xff] }
 0x35a   :  { %1616 = vmatpush.msrb.mxu2 %v3259_v3  ;;  %1636 = vmatpush.msrb.mxu3 %v3262_v44  ;;  %v1998_v3 = vld [vmem:[#allocation6 + $0x198] sm:$0xff]  ;;  %v1999_v44 = vld [vmem:[#allocation6 + $0x160] sm:$0xff] }
 0x35b   :  { %1656 = vmatpush.msra.mxu0 %v3265_v13  ;;  %1676 = vmatpush.msra.mxu1 %v3268_v4  ;;  %v2000_v13 = vld [vmem:[#allocation6 + $0x168] sm:$0xff]  ;;  %v2001_v4 = vld [vmem:[#allocation6 + $0x170] sm:$0xff] }
 0x35c   :  { %1617 = vmatpush.msrb.mxu2 %v3271_v57  ;;  %1637 = vmatpush.msrb.mxu3 %v3274_v10  ;;  %v2002_v57 = vld [vmem:[#allocation6 + $0x178] sm:$0xff]  ;;  %v2003_v10 = vld [vmem:[#allocation6 + $0x140] sm:$0xff] }
 0x35d   :  { %1657 = vmatpush.msra.mxu0 %v1993_v21  ;;  %1677 = vmatpush.msra.mxu1 %v1994_v61  ;;  %v3663_v21 = vld [vmem:[#allocation47_spill] sm:$0xff] }
 0x35e   :  { %1618 = vmatpush.msrb.mxu2 %v1995_v62  ;;  %1638 = vmatpush.msrb.mxu3 %v1996_v63  ;;  %v658_v61 = vadd.f32 %v3663_v21, %v3656_v55  ;;  %v3664_v62 = vld [vmem:[#allocation48_spill] sm:$0xff] }
 0x35f   :  { %1658 = vmatpush.msra.mxu0 %v1997_v0  ;;  %1678 = vmatpush.msra.mxu1 %v1998_v3  ;;  %v678_v63 = vadd.f32 %v3664_v62, %v3658_v59 }
 0x360   :  { %1619 = vmatpush.msrb.mxu2 %v1999_v44  ;;  %1639 = vmatpush.msrb.mxu3 %v2000_v13 }
 0x361   :  { %1659 = vmatpush.msra.mxu0 %v2001_v4  ;;  %1679 = vmatpush.msra.mxu1 %v2002_v57 }
 0x362   :  { %1620 = vmatpush.msrb.mxu2 %v2003_v10  ;;  %1640 = vmatpush.msrb.mxu3 %v2004_v25 }
 0x363   :  { %1660 = vmatpush.msra.mxu0 %v2005_v26  ;;  %1680 = vmatpush.msra.mxu1 %v2006_v27 }
 0x364   :  { %1621 = vmatpush.msrb.mxu2 %v2007_v28  ;;  %1641 = vmatpush.msrb.mxu3 %v2008_v29 }
 0x365   :  { %1661 = vmatpush.msra.mxu0 %v2009_v8  ;;  %1681 = vmatpush.msra.mxu1 %v2010_v2  ;;  %v3665_v2 = vld [vmem:[#allocation58_spill] sm:$0xff] }
 0x366   :  { %1622 = vmatpush.msrb.mxu2 %v2011_v60  ;;  %1642 = vmatpush.msrb.mxu3 %v2012_v14  ;;  %v718_v60 = vadd.f32 %v3665_v2, %v3660_v18 }
 0x367   :  { %1662 = vmatpush.msra.mxu0 %v2013_v16  ;;  %1682 = vmatpush.msra.mxu1 %v2014_v9 }
 0x368   :  { %1623 = vmatpush.msrb.mxu2 %v2015_v5  ;;  %1643 = vmatpush.msrb.mxu3 %v2016_v6 }
 0x369   :  { %1663 = vmatpush.msra.mxu0 %v2017_v7  ;;  %1683 = vmatpush.msra.mxu1 %v2018_v40 }
 0x36a   :  { %1624 = vmatpush.msrb.mxu2 %v2019_v15  ;;  %1644 = vmatpush.msrb.mxu3 %v2020_v11 }
 0x36b   :  { %1664 = vmatpush.msra.mxu0 %v2021_v17  ;;  %1684 = vmatpush.msra.mxu1 %v2022_v12 }
 0x36c   :  { %1625 = vmatpush.msrb.mxu2 %v2023_v1  ;;  %1645 = vmatpush.msrb.mxu3 %v2024_v30 }
 0x36d   :  { %1665 = vmatpush.msra.mxu0 %v2025_v31  ;;  %1685 = vmatpush.msra.mxu1 %v2026_v32 }
 0x36e   :  { %1626 = vmatpush.msrb.mxu2 %v2027_v33  ;;  %1646 = vmatpush.msrb.mxu3 %v2028_v34 }
 0x36f   :  { %1666 = vmatpush.msra.mxu0 %v2029_v35  ;;  %1686 = vmatpush.msra.mxu1 %v2030_v36 }
 0x370   :  { %1627 = vmatpush.msrb.mxu2 %v2031_v37  ;;  %1647 = vmatpush.msrb.mxu3 %v2032_v38 }
 0x371   :  { %1667 = vmatpush.msra.mxu0 %v2033_v39  ;;  %1687 = vmatpush.msra.mxu1 %v2034_v41 }
 0x372   :  { %1628 = vmatpush.msrb.mxu2 %v2035_v42  ;;  %1648 = vmatpush.msrb.mxu3 %v2036_v43 }
 0x373   :  { %1668 = vmatpush.msra.mxu0 %v2037_v45  ;;  %1688 = vmatpush.msra.mxu1 %v2038_v46 }
 0x374   :  { %1629 = vmatpush.msrb.mxu2 %v2039_v47  ;;  %1649 = vmatpush.msrb.mxu3 %v2040_v48 }
 0x375   :  { %1669 = vmatpush.msra.mxu0 %v2041_v50  ;;  %1689 = vmatpush.msra.mxu1 %v2042_v51 }
 0x376   :  { %1630 = vmatpush.msrb.mxu2 %v2043_v52  ;;  %1650 = vmatpush.msrb.mxu3 %v2044_v54 }
 0x377   :  { %1670 = vmatpush.msra.mxu0 %v2045_v56  ;;  %1690 = vmatpush.msra.mxu1 %v2046_v58 }
 0x3d4   :  { %v1378_v22 = vpop.f32.mrf.mxu0  ;;  %v1398_v8 = vpop.f32.mrf.mxu1 }
 0x3d5   :  { %v1403_v23 = vadd.f32 %v1378_v22, %v698_v20  ;;  %v1404_v9 = vadd.f32 %v1398_v8, %v718_v60  ;;  %v3669_v60 = vld [vmem:[#allocation61_spill] sm:$0xff] }
 0x3d7   :  { %v1868_v24 = vmul.f32 -1.442695, %v1403_v23 }
 0x3d9   :  { %1935 = vpow2.f32 %v1868_v24  ;;  %v1338_v0 = vpop.f32.mrf.mxu2  ;;  %v1358_v3 = vpop.f32.mrf.mxu3 }
 0x3da   :  { %v1401_v44 = vadd.f32 %v1338_v0, %v658_v61  ;;  %v1402_v13 = vadd.f32 %v1358_v3, %v678_v63  ;;  %v3667_v61 = vld [vmem:[#allocation51_spill] sm:$0xff]  ;;  %v3668_v63 = vld [vmem:[#allocation52_spill] sm:$0xff] }
 0x3db   :  { %v738_v62 = vadd.f32 %v3667_v61, %v3656_v55  ;;  %v758_v0 = vadd.f32 %v3668_v63, %v3658_v59  ;;  %v1773_v61 = vld [vmem:[#allocation7 + $0x58] sm:$0xff]  ;;  %v1771_v63 = vld [vmem:[#allocation7 + $0x48] sm:$0xff] }
 0x3dc   :  { %v1866_v4 = vmul.f32 -1.442695, %v1401_v44  ;;  %v1867_v57 = vmul.f32 -1.442695, %v1402_v13 }
 0x3de   :  { %1937 = vpow2.f32 %v1866_v4 }
 0x3df   :  { %v1936_v10 = vpop.eup %1935  ;;  %1939 = vpow2.f32 %v1867_v57 }
 0x3e0   :  { %v1416_v25 = vadd.f32 1.0, %v1936_v10 }
 0x3e2   :  { %1941 = vrcp.f32 %v1416_v25  ;;  %v1458_v51 = vand.u32 2147483648, %v1416_v25  ;;  %vm1452_vm14 = vweird.f32 %v1416_v25  ;;  %v1456_v52 = vand.u32 2147483647, %v1416_v25 }
 0x3e4   :  { %v1938_v26 = vpop.eup %1937  ;;  %v1459_v56 = vor.u32 1.1754944e-38, %v1458_v51  ;;  %vm1457_vm0 = vcmp.eq.f32.partialorder %v1456_v52, 8.507059e+37 }
 0x3e5   :  { %v1940_v27 = vpop.eup %1939  ;;  %v1414_v28 = vadd.f32 1.0, %v1938_v26 }
 0x3e6   :  { %v1415_v29 = vadd.f32 1.0, %v1940_v27 }
 0x3e7   :  { %1943 = vrcp.f32 %v1414_v28  ;;  %v1428_v11 = vand.u32 2147483648, %v1414_v28  ;;  %v1426_v1 = vand.u32 2147483647, %v1414_v28  ;;  %vm1422_vm7 = vweird.f32 %v1414_v28 }
 0x3e8   :  { %1945 = vrcp.f32 %v1415_v29  ;;  %v1942_v14 = vpop.eup %1941  ;;  %v1443_v30 = vand.u32 2147483648, %v1415_v29  ;;  %v1441_v32 = vand.u32 2147483647, %v1415_v29  ;;  %vm1437_vm9 = vweird.f32 %v1415_v29 }
 0x3e9   :  { %v1448_v40 = vmul.f32 %v1942_v14, %v1416_v25  ;;  %1947 = vtanh.f32 %v1404_v9  ;;  %v1429_v35 = vor.u32 1.1754944e-38, %v1428_v11  ;;  %vm1427_vm10 = vcmp.eq.f32.partialorder %v1426_v1, 8.507059e+37 }
 0x3ea   :  { %v1444_v38 = vor.u32 1.1754944e-38, %v1443_v30  ;;  %vm1442_vm12 = vcmp.eq.f32.partialorder %v1441_v32, 8.507059e+37  ;;  %vm1453_vm13 = vweird.f32 %v1942_v14 }
 0x3eb   :  { %v1449_v33 = vsub.f32 1.0, %v1448_v40  ;;  %vm1454_vm15 = vmor %vm1452_vm14, %vm1453_vm13 }
 0x3ed   :  { %v1944_v16 = vpop.eup %1943  ;;  %v1450_v45 = vmul.f32 %v1942_v14, %v1449_v33 }
 0x3ee   :  { %v1946_v5 = vpop.eup %1945  ;;  %v1418_v6 = vmul.f32 %v1944_v16, %v1414_v28  ;;  %vm1423_vm5 = vweird.f32 %v1944_v16 }
 0x3ef   :  { %v1433_v7 = vmul.f32 %v1946_v5, %v1415_v29  ;;  %vm1438_vm6 = vweird.f32 %v1946_v5  ;;  %vm1424_vm8 = vmor %vm1422_vm7, %vm1423_vm5  ;;  %v1948_v39 = vpop.eup %1947  ;;  %v1451_v50 = vadd.f32 %v1942_v14, %v1450_v45 }
 0x3f0   :  { %v1419_v15 = vsub.f32 1.0, %v1418_v6  ;;  %vm1439_vm11 = vmor %vm1437_vm9, %vm1438_vm6 }
 0x3f1   :  { %v1434_v17 = vsub.f32 1.0, %v1433_v7  ;;  %v1455_v54 = vsel %vm1454_vm15, %v1942_v14, %v1451_v50  ;;  %v798_v14 = vadd.f32 %v3669_v60, %v3660_v18 }
 0x3f2   :  { %v1420_v12 = vmul.f32 %v1944_v16, %v1419_v15  ;;  %v1460_v19 = vsel %vm1457_vm0, %v1459_v56, %v1455_v54 }
 0x3f3   :  { %v1435_v31 = vmul.f32 %v1946_v5, %v1434_v17 }
 0x3f4   :  { %v1421_v34 = vadd.f32 %v1944_v16, %v1420_v12 }
 0x3f5   :  { %v1436_v36 = vadd.f32 %v1946_v5, %v1435_v31 }
 0x3f6   :  { %v1425_v37 = vsel %vm1424_vm8, %v1944_v16, %v1421_v34 }
 0x3f7   :  { %v1430_v41 = vsel %vm1427_vm10, %v1429_v35, %v1425_v37  ;;  %v1440_v42 = vsel %vm1439_vm11, %v1946_v5, %v1436_v36 }
 0x3f8   :  { %v1445_v43 = vsel %vm1442_vm12, %v1444_v38, %v1440_v42  ;;  %v1464_v46 = vmul.f32 %v1948_v39, %v1430_v41 }
 0x3f9   :  { %v1463_v47 = vmul.f32 %v1445_v43, %v3340_v53  ;;  %v3666_v53 = vld [vmem:[#allocation50_spill] sm:$0xff] }
 0x3fa   :  { %v778_v22 = vadd.f32 %v3666_v53, %v3654_v49 }
 0x3fb   :  { %v3362_v48 = vadd.f32 %v1464_v46, %v1463_v47 }
 0x3fd   :  { %1949 = vtanh.f32 %v3362_v48 }
 0x403   :  { %v1950_v58 = vpop.eup %1949 }
 0x404   :  { %v1467_v20 = vmul.f32 %v1950_v58, %v1460_v19 }
 0x406   :  { %1484 = vmatmul.f32.vlgmr.msra.gmra.mxu2 %v1467_v20  ;;  %1504 = vmatmul.f32.vlgmr.msra.gmra.mxu3 %v1467_v20 }
 0x407   :  { %1524 = vmatmul.f32.vlgmr.msrb.gmra.mxu0 %v1467_v20  ;;  %1544 = vmatmul.f32.vlgmr.msrb.gmra.mxu1 %v1467_v20 }
 0x484   :  { %v1525_v23 = vpop.f32.mrf.mxu0  ;;  %v1545_v2 = vpop.f32.mrf.mxu1 }
 0x485   :  { %v1550_v24 = vadd.f32 %v1525_v23, %v778_v22  ;;  %v1551_v5 = vadd.f32 %v1545_v2, %v798_v14  ;;  %v1776_v23 = vld [vmem:[#allocation7 + $0x70] sm:$0xff] }
 0x487   :  { %v1871_v21 = vmul.f32 -1.442695, %v1550_v24  ;;  %v1775_v24 = vld [vmem:[#allocation7 + $0x68] sm:$0xff] }
 0x489   :  { %1951 = vpow2.f32 %v1871_v21  ;;  %v1485_v3 = vpop.f32.mrf.mxu2  ;;  %v1505_v44 = vpop.f32.mrf.mxu3  ;;  %v1774_v21 = vld [vmem:[#allocation7 + $0x60] sm:$0xff] }
 0x48a   :  { %v1548_v13 = vadd.f32 %v1485_v3, %v738_v62  ;;  %v1549_v4 = vadd.f32 %v1505_v44, %v758_v0  ;;  %v1772_v62 = vld [vmem:[#allocation7 + $0x50] sm:$0xff]  ;;  %v3670_v0 = vld [vmem:[#allocation54_spill] sm:$0xff] }
 0x48b   :  { %v858_v3 = vadd.f32 %v3670_v0, %v3654_v49  ;;  %v1809_v0 = vld [vmem:[#allocation9 + $0x30] sm:$0xff] }
 0x48c   :  { %v1869_v57 = vmul.f32 -1.442695, %v1548_v13  ;;  %v1870_v10 = vmul.f32 -1.442695, %v1549_v4  ;;  %v1770_v13 = vld [vmem:[#allocation7 + $0x40] sm:$0xff] }
 0x48e   :  { %1953 = vpow2.f32 %v1869_v57  ;;  %v1769_v57 = vld [vmem:[#allocation7 + $0x38] sm:$0xff] }
 0x48f   :  { %v1952_v25 = vpop.eup %1951  ;;  %1955 = vpow2.f32 %v1870_v10 }
 0x490   :  { %v1563_v26 = vadd.f32 1.0, %v1952_v25  ;;  %v1768_v25 = vld [vmem:[#allocation7 + $0x30] sm:$0xff] }
 0x492   :  { %1957 = vrcp.f32 %v1563_v26  ;;  %v1605_v54 = vand.u32 2147483648, %v1563_v26  ;;  %vm1599_vm10 = vweird.f32 %v1563_v26  ;;  %v1603_v56 = vand.u32 2147483647, %v1563_v26 }
 0x494   :  { %v1954_v27 = vpop.eup %1953  ;;  %v1606_v19 = vor.u32 1.1754944e-38, %v1605_v54  ;;  %vm1604_vm12 = vcmp.eq.f32.partialorder %v1603_v56, 8.507059e+37 }
 0x495   :  { %v1956_v28 = vpop.eup %1955  ;;  %v1561_v29 = vadd.f32 1.0, %v1954_v27 }
 0x496   :  { %v1562_v8 = vadd.f32 1.0, %v1956_v28  ;;  %v3672_v28 = vld [vmem:[#allocation57_spill] sm:$0xff] }
 0x497   :  { %1959 = vrcp.f32 %v1561_v29  ;;  %v1575_v17 = vand.u32 2147483648, %v1561_v29  ;;  %v1573_v30 = vand.u32 2147483647, %v1561_v29  ;;  %vm1569_vm3 = vweird.f32 %v1561_v29 }
 0x498   :  { %1961 = vrcp.f32 %v1562_v8  ;;  %v1958_v16 = vpop.eup %1957  ;;  %v1590_v31 = vand.u32 2147483648, %v1562_v8  ;;  %v1588_v33 = vand.u32 2147483647, %v1562_v8  ;;  %vm1584_vm5 = vweird.f32 %v1562_v8 }
 0x499   :  { %v1595_v15 = vmul.f32 %v1958_v16, %v1563_v26  ;;  %1963 = vtanh.f32 %v1551_v5  ;;  %v1576_v36 = vor.u32 1.1754944e-38, %v1575_v17  ;;  %vm1574_vm6 = vcmp.eq.f32.partialorder %v1573_v30, 8.507059e+37  ;;  %v3671_v26 = vld [vmem:[#allocation56_spill] sm:$0xff] }
 0x49a   :  { %v1591_v39 = vor.u32 1.1754944e-38, %v1590_v31  ;;  %vm1589_vm8 = vcmp.eq.f32.partialorder %v1588_v33, 8.507059e+37  ;;  %vm1600_vm9 = vweird.f32 %v1958_v16  ;;  %v818_v27 = vadd.f32 %v3671_v26, %v3656_v55  ;;  %v1763_v55 = vld [vmem:[#allocation7 + $0x8] sm:$0xff]  ;;  %v1818_v30 = vld [vmem:[#allocation9 + $0x78] sm:$0xff]  ;;  %v1817_v31 = vld [vmem:[#allocation9 + $0x70] sm:$0xff] }
 0x49b   :  { %v1596_v34 = vsub.f32 1.0, %v1595_v15  ;;  %vm1601_vm11 = vmor %vm1599_vm10, %vm1600_vm9  ;;  %v1762_v15 = vld [vmem:[#allocation7] sm:$0xff]  ;;  %1823 = vmatpush.msra.mxu3 %v1818_v30 }
 0x49d   :  { %v1960_v9 = vpop.eup %1959  ;;  %v1597_v46 = vmul.f32 %v1958_v16, %v1596_v34  ;;  %1824 = vmatpush.msra.mxu3 %v1817_v31  ;;  %v1815_v34 = vld [vmem:[#allocation9 + $0x60] sm:$0xff] }
 0x49e   :  { %v1962_v6 = vpop.eup %1961  ;;  %v1565_v7 = vmul.f32 %v1960_v9, %v1561_v29  ;;  %vm1570_vm1 = vweird.f32 %v1960_v9  ;;  %v838_v29 = vadd.f32 %v3672_v28, %v3658_v59 }
 0x49f   :  { %v1580_v40 = vmul.f32 %v1962_v6, %v1562_v8  ;;  %vm1585_vm2 = vweird.f32 %v1962_v6  ;;  %vm1571_vm4 = vmor %vm1569_vm3, %vm1570_vm1  ;;  %v1964_v41 = vpop.eup %1963  ;;  %v1598_v52 = vadd.f32 %v1958_v16, %v1597_v46  ;;  %v1767_v8 = vld [vmem:[#allocation7 + $0x28] sm:$0xff] }
 0x4a0   :  { %v1566_v11 = vsub.f32 1.0, %v1565_v7  ;;  %vm1586_vm7 = vmor %vm1584_vm5, %vm1585_vm2  ;;  %v1764_v7 = vld [vmem:[#allocation7 + $0x10] sm:$0xff] }
 0x4a1   :  { %v1581_v12 = vsub.f32 1.0, %v1580_v40  ;;  %v1602_v58 = vsel %vm1601_vm11, %v1958_v16, %v1598_v52  ;;  %v1766_v16 = vld [vmem:[#allocation7 + $0x20] sm:$0xff]  ;;  %v1812_v52 = vld [vmem:[#allocation9 + $0x48] sm:$0xff] }
 0x4a2   :  { %v1567_v1 = vmul.f32 %v1960_v9, %v1566_v11  ;;  %v1607_v53 = vsel %vm1604_vm12, %v1606_v19, %v1602_v58 }
 0x4a3   :  { %v1582_v32 = vmul.f32 %v1962_v6, %v1581_v12 }
 0x4a4   :  { %v1568_v35 = vadd.f32 %v1960_v9, %v1567_v1 }
 0x4a5   :  { %v1583_v37 = vadd.f32 %v1962_v6, %v1582_v32  ;;  %v1816_v32 = vld [vmem:[#allocation9 + $0x68] sm:$0xff] }
 0x4a6   :  { %v1572_v38 = vsel %vm1571_vm4, %v1960_v9, %v1568_v35  ;;  %v3673_v35 = vld [vmem:[#allocation62_spill] sm:$0xff]  ;;  %1825 = vmatpush.msra.mxu3 %v1816_v32 }
 0x4a7   :  { %v1577_v42 = vsel %vm1574_vm6, %v1576_v36, %v1572_v38  ;;  %v1587_v43 = vsel %vm1586_vm7, %v1962_v6, %v1583_v37  ;;  %v1765_v6 = vld [vmem:[#allocation7 + $0x18] sm:$0xff]  ;;  %v878_v36 = vadd.f32 %v3673_v35, %v3660_v18 }
 0x4a8   :  { %v1592_v45 = vsel %vm1589_vm8, %v1591_v39, %v1587_v43  ;;  %v1611_v47 = vmul.f32 %v1964_v41, %v1577_v42  ;;  %v1814_v38 = vld [vmem:[#allocation9 + $0x58] sm:$0xff]  ;;  %1826 = vmatpush.msra.mxu3 %v1815_v34 }
 0x4a9   :  { %v1610_v50 = vmul.f32 %v1592_v45, %v3362_v48  ;;  %v1777_v48 = vld [vmem:[#allocation7 + $0x78] sm:$0xff]  ;;  %v1813_v45 = vld [vmem:[#allocation9 + $0x50] sm:$0xff] }
 0x4aa   :  { %1782 = vmatpush.msra.mxu2 %v1777_v48  ;;  %1827 = vmatpush.msra.mxu3 %v1814_v38 }
 0x4ab   :  { %v3374_v51 = vadd.f32 %v1611_v47, %v1610_v50 }
 0x4ac   :  { %1783 = vmatpush.msra.mxu2 %v1776_v23  ;;  %1828 = vmatpush.msra.mxu3 %v1813_v45 }
 0x4ad   :  { %1965 = vtanh.f32 %v3374_v51 }
 0x4ae   :  { %1784 = vmatpush.msra.mxu2 %v1775_v24  ;;  %1829 = vmatpush.msra.mxu3 %v1812_v52  ;;  %v1810_v24 = vld [vmem:[#allocation9 + $0x38] sm:$0xff] }
 0x4b0   :  { %1785 = vmatpush.msra.mxu2 %v1774_v21 }
 0x4b2   :  { %1786 = vmatpush.msra.mxu2 %v1773_v61 }
 0x4b3   :  { %v1966_v20 = vpop.eup %1965 }
 0x4b4   :  { %v1614_v22 = vmul.f32 %v1966_v20, %v1607_v53  ;;  %1787 = vmatpush.msra.mxu2 %v1772_v62  ;;  %v1811_v20 = vld [vmem:[#allocation9 + $0x40] sm:$0xff] }
 0x4b5   :  { %1830 = vmatpush.msra.mxu3 %v1811_v20 }
 0x4b6   :  { %1631 = vmatmul.f32.vlgmr.msrb.gmra.mxu2 %v1614_v22  ;;  %1651 = vmatmul.f32.vlgmr.msrb.gmra.mxu3 %v1614_v22 }
 0x4b7   :  { %1671 = vmatmul.f32.vlgmr.msra.gmra.mxu0 %v1614_v22  ;;  %1691 = vmatmul.f32.vlgmr.msra.gmra.mxu1 %v1614_v22 }
 0x4b8   :  { %1788 = vmatpush.msra.mxu2 %v1771_v63  ;;  %1831 = vmatpush.msra.mxu3 %v1810_v24 }
 0x4ba   :  { %1789 = vmatpush.msra.mxu2 %v1770_v13  ;;  %1832 = vmatpush.msra.mxu3 %v1809_v0 }
 0x4bc   :  { %1790 = vmatpush.msra.mxu2 %v1769_v57 }
 0x4be   :  { %1791 = vmatpush.msra.mxu2 %v1768_v25  ;;  %v1808_v25 = vld [vmem:[#allocation9 + $0x28] sm:$0xff] }
 0x4bf   :  { %1833 = vmatpush.msra.mxu3 %v1808_v25 }
 0x4c0   :  { %1792 = vmatpush.msra.mxu2 %v1767_v8  ;;  %v1806_v8 = vld [vmem:[#allocation9 + $0x18] sm:$0xff] }
 0x4c2   :  { %1793 = vmatpush.msra.mxu2 %v1766_v16 }
 0x4c4   :  { %1794 = vmatpush.msra.mxu2 %v1765_v6  ;;  %v1804_v6 = vld [vmem:[#allocation9 + $0x8] sm:$0xff] }
 0x4c6   :  { %1795 = vmatpush.msra.mxu2 %v1764_v7  ;;  %v1803_v7 = vld [vmem:[#allocation9] sm:$0xff] }
 0x4c8   :  { %1796 = vmatpush.msra.mxu2 %v1763_v55 }
 0x4ca   :  { %1797 = vmatpush.msra.mxu2 %v1762_v15 }
 0x534   :  { %v1672_v44 = vpop.f32.mrf.mxu0  ;;  %v1692_v33 = vpop.f32.mrf.mxu1 }
 0x535   :  { %v1697_v4 = vadd.f32 %v1672_v44, %v858_v3  ;;  %v1698_v41 = vadd.f32 %v1692_v33, %v878_v36 }
 0x537   :  { %v1874_v10 = vmul.f32 -1.442695, %v1697_v4 }
 0x539   :  { %1967 = vpow2.f32 %v1874_v10  ;;  %v1632_v2 = vpop.f32.mrf.mxu2  ;;  %v1652_v60 = vpop.f32.mrf.mxu3 }
 0x53a   :  { %v1695_v49 = vadd.f32 %v1632_v2, %v818_v27  ;;  %v1696_v14 = vadd.f32 %v1652_v60, %v838_v29  ;;  %v1807_v27 = vld [vmem:[#allocation9 + $0x20] sm:$0xff] }
 0x53b   :  { %1834 = vmatpush.msra.mxu3 %v1807_v27 }
 0x53c   :  { %v1872_v9 = vmul.f32 -1.442695, %v1695_v49  ;;  %v1873_v5 = vmul.f32 -1.442695, %v1696_v14 }
 0x53d   :  { %1835 = vmatpush.msra.mxu3 %v1806_v8 }
 0x53e   :  { %1969 = vpow2.f32 %v1872_v9 }
 0x53f   :  { %v1968_v40 = vpop.eup %1967  ;;  %1971 = vpow2.f32 %v1873_v5  ;;  %v1805_v5 = vld [vmem:[#allocation9 + $0x10] sm:$0xff] }
 0x540   :  { %v3383_v59 = vadd.f32 1.0, %v1968_v40  ;;  %1836 = vmatpush.msra.mxu3 %v1805_v5  ;;  %v1885_v40 = vld [vmem:[%s3416_s7] ss:$0 sm:$0xff] }
 0x542   :  { %1973 = vrcp.f32 %v3383_v59  ;;  %v1752_v2 = vand.u32 2147483648, %v3383_v59  ;;  %vm1746_vm6 = vweird.f32 %v3383_v59  ;;  %v1750_v60 = vand.u32 2147483647, %v3383_v59  ;;  %1837 = vmatpush.msra.mxu3 %v1804_v6 }
 0x544   :  { %v1970_v11 = vpop.eup %1969  ;;  %v1753_v49 = vor.u32 1.1754944e-38, %v1752_v2  ;;  %vm1751_vm8 = vcmp.eq.f32.partialorder %v1750_v60, 8.507059e+37  ;;  %1838 = vmatpush.msra.mxu3 %v1803_v7 }
 0x545   :  { %v1972_v17 = vpop.eup %1971  ;;  %v1708_v12 = vadd.f32 1.0, %v1970_v11  ;;  %v1886_v11 = vld [vmem:[%s3418_s9] ss:$0 sm:$0xff] }
 0x546   :  { %v1709_v1 = vadd.f32 1.0, %v1972_v17 }
 0x547   :  { %1975 = vrcp.f32 %v1708_v12  ;;  %v1722_v54 = vand.u32 2147483648, %v1708_v12  ;;  %v1720_v58 = vand.u32 2147483647, %v1708_v12  ;;  %vm1716_vm15 = vweird.f32 %v1708_v12 }
 0x548   :  { %1977 = vrcp.f32 %v1709_v1  ;;  %v3388_v37 = vpop.eup %1973  ;;  %v1737_v19 = vand.u32 2147483648, %v1709_v1  ;;  %v1735_v22 = vand.u32 2147483647, %v1709_v1  ;;  %vm1731_vm1 = vweird.f32 %v1709_v1 }
 0x549   :  { %v1742_v47 = vmul.f32 %v3388_v37, %v3383_v59  ;;  %1979 = vtanh.f32 %v1698_v41  ;;  %v1723_v21 = vor.u32 1.1754944e-38, %v1722_v54  ;;  %vm1721_vm2 = vcmp.eq.f32.partialorder %v1720_v58, 8.507059e+37 }
 0x54a   :  { %v1738_v63 = vor.u32 1.1754944e-38, %v1737_v19  ;;  %vm1736_vm4 = vcmp.eq.f32.partialorder %v1735_v22, 8.507059e+37  ;;  %vm1747_vm5 = vweird.f32 %v3388_v37 }
 0x54b   :  { %v1743_v48 = vsub.f32 1.0, %v1742_v47  ;;  %vm1748_vm7 = vmor %vm1746_vm6, %vm1747_vm5 }
 0x54d   :  { %v1976_v39 = vpop.eup %1975  ;;  %v1744_v57 = vmul.f32 %v3388_v37, %v1743_v48 }
 0x54e   :  { %v1978_v42 = vpop.eup %1977  ;;  %v1712_v43 = vmul.f32 %v1976_v39, %v1708_v12  ;;  %vm1717_vm13 = vweird.f32 %v1976_v39 }
 0x54f   :  { %v1727_v46 = vmul.f32 %v1978_v42, %v1709_v1  ;;  %vm1732_vm14 = vweird.f32 %v1978_v42  ;;  %vm1718_vm0 = vmor %vm1716_vm15, %vm1717_vm13  ;;  %v1980_v3 = vpop.eup %1979  ;;  %v1745_v29 = vadd.f32 %v3388_v37, %v1744_v57 }
 0x550   :  { %v1713_v50 = vsub.f32 1.0, %v1712_v43  ;;  %vm1733_vm3 = vmor %vm1731_vm1, %vm1732_vm14 }
 0x551   :  { %v1728_v18 = vsub.f32 1.0, %v1727_v46 }
 0x552   :  { %v1714_v56 = vmul.f32 %v1976_v39, %v1713_v50 }
 0x553   :  { %v1729_v53 = vmul.f32 %v1978_v42, %v1728_v18 }
 0x554   :  { %v1715_v23 = vadd.f32 %v1976_v39, %v1714_v56 }
 0x555   :  { %v1730_v61 = vadd.f32 %v1978_v42, %v1729_v53 }
 0x556   :  { %v1719_v62 = vsel %vm1718_vm0, %v1976_v39, %v1715_v23 }
 0x557   :  { %v1734_v44 = vsel %vm1733_vm3, %v1978_v42, %v1730_v61  ;;  %v1724_v13 = vsel %vm1721_vm2, %v1723_v21, %v1719_v62 }
 0x558   :  { %v1739_v4 = vsel %vm1736_vm4, %v1738_v63, %v1734_v44  ;;  %v1758_v10 = vmul.f32 %v1980_v3, %v1724_v13 }
 0x559   :  { %v1757_v26 = vmul.f32 %v1739_v4, %v3374_v51  ;;  %v1749_v51 = vsel %vm1748_vm7, %v3388_v37, %v1745_v29 }
 0x55a   :  { %v1754_v16 = vsel %vm1751_vm8, %v1753_v49, %v1749_v51 }
 0x55b   :  { %v1759_v28 = vadd.f32 %v1758_v10, %v1757_v26 }
 0x55d   :  { %1981 = vtanh.f32 %v1759_v28 }
 0x563   :  { %v1982_v14 = vpop.eup %1981 }
 0x564   :  { %v1761_v9 = vmul.f32 %v1982_v14, %v1754_v16 }
 0x566   :  { %1798 = vmatmul.f32.vlgmr.msra.gmra.mxu2 %v1761_v9 }
 0x5e9   :  { %v1799_v55 = vpop.f32.mrf.mxu2 }
 0x5ea   :  { %v1800_v59 = vadd.f32 %v1885_v40, %v1799_v55 }
 0x5ec   :  { %v1802_v15 = vmax.f32 %v1800_v59, 0.0 }
 0x5ee   :  { %1839 = vmatmul.f32.vlgmr.msra.gmra.mxu3 %v1802_v15 }
 0x671   :  { %v1840_v17 = vpop.f32.mrf.mxu3 }
 0x672   :  { %v1841_v12 = vadd.f32 %v1886_v11, %v1840_v17 }
 0x674   :  { %1843 = vst [vmem:[%s3419_s10] sm:$0xff] %v1841_v12 }
 0x675   :  { %1848 = vsyncpa [#allocation3], 1 }
 0x676   :  { %1849 = vsyncpa [#allocation5], 1 }
 0x677   :  { %1850 = vsyncpa [#allocation8], 1 }

</bundles_post_ra>
